<compile_context>
chip_gen: v5e
topology: v5e:2x2
jax: 0.10.0
libtpu: 0.0.40
codegen_flags: <defaults>
</compile_context>

<pallas_src>
import functools

import jax
import jax.numpy as jnp
from jax.experimental import pallas as pl
from jax.experimental.pallas import tpu as pltpu

# ----------------------------- model config ---------------------------------
IN_CHANNELS = 16
HIDDEN = 32                 # = heads * c_per_head (GATConv output width)
NUM_LAYERS = 3
HEADS = 4
C_PER_HEAD = HIDDEN // HEADS
N_NODES = 32                # total nodes in the batch
N_GRAPHS = 2                # graphs in the batch
G_PAD = 8                   # sublane-padded graph count for the pooled rows
OUT_PAD = 128               # lane-padded final output width (real width = 1)
F_PAD = max(IN_CHANNELS, HIDDEN)   # pad layer-0 input so all layer weights stack
NEG_INF = -1e30

assert HIDDEN % HEADS == 0
assert HIDDEN >= IN_CHANNELS        # so activations stay [N, F_PAD] between layers
assert N_GRAPHS <= G_PAD


# ------------------------------ fused kernel ---------------------------------
def fused_gat_kernel(x_ref, w_ref, wsrc_ref, wdst_ref, b_ref,
                     i_tile_ref, blk_ones_ref, neg_bias_ref, bd_mask_ref,
                     seg_ref, w1_ref, b1_ref, w2_ref, b2_ref,
                     out_ref, *, num_layers, heads, negative_slope=0.2):
    # Shapes (N = nodes, H = heads, C = per-head channels, G = padded graphs):
    #   x        [N, F_PAD]         zero-padded node features
    #   w        [L, F_PAD, H*C]    stacked GATConv weights (layer 0 zero-padded rows)
    #   wsrc/dst [L, H*C, H*N]      att_src/att_dst expanded per head block
    #   b        [L, 1, H*C]        GATConv biases
    #   i_tile   [N, H*N]           H horizontally tiled identities
    #   blk_ones [H*N, H*N]         block-diagonal all-ones (per-head row-sum operator)
    #   neg_bias [N, H*N]           0 where edge (incl. self-loop), -1e30 otherwise
    #   bd_mask  [H*N, H*C]         block-diagonal head mask
    #   seg      [G, N]             one-hot graph membership (rows >= n_graphs are 0)
    #   w2/b2    [64, 128]/[1,128]  last linear padded to 128 lanes (col 0 is real)
    h = x_ref[...]
    i_tile = i_tile_ref[...]
    blk_ones = blk_ones_ref[...]
    neg_bias = neg_bias_ref[...]
    bd_mask = bd_mask_ref[...]

    for l in range(num_layers):                    # fully unrolled (3 layers)
        w = w_ref[l]                               # [F_PAD, H*C]
        h_all = jnp.dot(h, w, preferred_element_type=jnp.float32)          # [N, H*C]

        # Per-head attention scores, already expanded to lane-dense [N, H*N]:
        #   sd_exp[i, h*N+j] = <h_all[i], att_dst_h>   (constant over j)
        #   ss_exp[i, h*N+j] = <h_all[i], att_src_h>   (constant over j)
        sd_exp = jnp.dot(h_all, wdst_ref[l], preferred_element_type=jnp.float32)
        ss_exp = jnp.dot(h_all, wsrc_ref[l], preferred_element_type=jnp.float32)
        # Source score of node j placed at column h*N+j, broadcast over all rows i
        # (diag-extract via tiled identity + sublane reduce).
        src_row = jnp.sum(ss_exp * i_tile, axis=0, keepdims=True)          # [1, H*N]

        e = sd_exp + src_row                                               # [N, H*N]
        e = jnp.where(e > 0.0, e, negative_slope * e)                      # LeakyReLU
        e = e + neg_bias                                                   # edge mask

        # Softmax over incoming edges, per head block. A single per-row shift is a
        # constant within every head block, so softmax is exact; masked entries
        # underflow to 0. Every row/head has a self-loop, so denom > 0.
        m = jnp.max(e, axis=-1, keepdims=True)                             # [N, 1]
        p = jnp.exp(e - m)                                                 # [N, H*N]
        denom = jnp.dot(p, blk_ones, preferred_element_type=jnp.float32)   # [N, H*N]
        alpha = p * pl.reciprocal(jnp.maximum(denom, 1e-30), approx=True)  # EUP

        # Aggregate all heads with one lane-dense matmul against block-diag(h_all).
        bd = jnp.concatenate([h_all] * heads, axis=0) * bd_mask            # [H*N, H*C]
        out = jnp.dot(alpha, bd, preferred_element_type=jnp.float32) + b_ref[l]
        if l < num_layers - 1:
            out = jnp.maximum(out, 0.0)                                    # ReLU
        h = out                                                            # [N, HIDDEN]

    # global_add_pool == one-hot segment matrix @ node embeddings.
    pooled = jnp.dot(seg_ref[...], h, preferred_element_type=jnp.float32)  # [G, HIDDEN]
    # ffn_dropout(p=0.25) is identity in eval mode.
    z = jnp.dot(pooled, w1_ref[...], preferred_element_type=jnp.float32) + b1_ref[...]
    z = jnp.maximum(z, 0.0)                                                # ReLU
    # Lane-dense [G_PAD, 128] store (column 0 is the real prediction).
    out_ref[...] = (jnp.dot(z, w2_ref[...], preferred_element_type=jnp.float32)
                    + b2_ref[...])


# ------------------------------ wrapper --------------------------------------
_VMEM = pl.BlockSpec(memory_space=pltpu.MemorySpace.VMEM)


def gat_model_forward(x, adj, seg, params):
    """x [N, in_ch]; adj [N, N] (adj[i, j]=1 iff edge j->i, self-loops set); seg [G, N]."""
    n = x.shape[0]
    heads, c, hdim = HEADS, C_PER_HEAD, HIDDEN
    g = seg.shape[0]

    # ---- constants shared by all layers (built once, outside the kernel) ----
    eye_h = jnp.eye(heads, dtype=jnp.float32)
    i_tile = jnp.tile(jnp.eye(n, dtype=jnp.float32), (1, heads))            # [N, H*N]
    blk_ones = jnp.kron(eye_h, jnp.ones((n, n), jnp.float32))               # [H*N, H*N]
    bd_mask = jnp.kron(eye_h, jnp.ones((n, c), jnp.float32))                # [H*N, H*C]
    head_blk = jnp.kron(eye_h, jnp.ones((c, n), jnp.float32))               # [H*C, H*N]
    blk_bias = jnp.where(adj > 0, 0.0, NEG_INF).astype(jnp.float32)         # [N, N]
    neg_bias = jnp.tile(blk_bias, (1, heads))                               # [N, H*N]

    # ---- stack per-layer parameters (layer 0 zero-padded to F_PAD rows) ----
    w_stack, wsrc_stack, wdst_stack, b_stack = [], [], [], []
    for (w, a_src, a_dst, b) in params["layers"]:
        f_in = w.shape[0]
        w_pad = jnp.zeros((F_PAD, hdim), jnp.float32).at[:f_in, :].set(w)
        w_stack.append(w_pad)
        wsrc_stack.append(a_src.reshape(-1, 1) * head_blk)                  # [H*C, H*N]
        wdst_stack.append(a_dst.reshape(-1, 1) * head_blk)
        b_stack.append(b.reshape(1, hdim))
    w_stack = jnp.stack(w_stack)                                            # [L, F_PAD, H*C]
    wsrc_stack = jnp.stack(wsrc_stack)                                      # [L, H*C, H*N]
    wdst_stack = jnp.stack(wdst_stack)
    b_stack = jnp.stack(b_stack)                                            # [L, 1, H*C]

    x_pad = jnp.zeros((n, F_PAD), jnp.float32).at[:, : x.shape[1]].set(x)

    # ---- sublane-pad the pooling matrix, lane-pad the last linear ----
    seg_pad = jnp.zeros((G_PAD, n), jnp.float32).at[:g, :].set(seg)         # [G_PAD, N]
    w2_pad = jnp.zeros((64, OUT_PAD), jnp.float32).at[:, :1].set(params["w2"])
    b2_pad = jnp.zeros((1, OUT_PAD), jnp.float32).at[:, :1].set(params["b2"])

    kernel = functools.partial(fused_gat_kernel,
                               num_layers=len(params["layers"]), heads=heads)
    out_full = pl.pallas_call(
        kernel,
        out_shape=jax.ShapeDtypeStruct((G_PAD, OUT_PAD), jnp.float32),
        in_specs=[_VMEM] * 14,
        out_specs=_VMEM,
    )(x_pad, w_stack, wsrc_stack, wdst_stack, b_stack,
      i_tile, blk_ones, neg_bias, bd_mask,
      seg_pad, params["w1"], params["b1"], w2_pad, b2_pad)

    return out_full[:g, :1]                                                 # [G, 1]


# --------------------------- deterministic init ------------------------------
def init_params(key):
    params = {"layers": []}
    fan_in = IN_CHANNELS
    for _ in range(NUM_LAYERS):
        key, k1, k2, k3 = jax.random.split(key, 4)
        w = 0.1 * jax.random.normal(k1, (fan_in, HIDDEN), jnp.float32)
        a_s = 0.1 * jax.random.normal(k2, (1, HIDDEN), jnp.float32)
        a_d = 0.1 * jax.random.normal(k3, (1, HIDDEN), jnp.float32)
        b = jnp.zeros((1, HIDDEN), jnp.float32)
        params["layers"].append((w, a_s, a_d, b))
        fan_in = HIDDEN
    key, k1, k2 = jax.random.split(key, 3)
    params["w1"] = 0.1 * jax.random.normal(k1, (HIDDEN, 64), jnp.float32)
    params["b1"] = jnp.zeros((1, 64), jnp.float32)
    params["w2"] = 0.1 * jax.random.normal(k2, (64, 1), jnp.float32)
    params["b2"] = jnp.zeros((1, 1), jnp.float32)
    return params


def build_graph(key):
    """Deterministic batched graph: 2 graphs x 16 nodes, random SIMPLE undirected
    intra-graph edges (no duplicate edges, so the dense-adjacency formulation is
    exactly equivalent to PyG's scatter-softmax)."""
    key, kx, ka = jax.random.split(key, 3)
    x = jax.random.normal(kx, (N_NODES, IN_CHANNELS), jnp.float32)

    npg = N_NODES // N_GRAPHS
    adj = jnp.zeros((N_NODES, N_NODES), jnp.float32)
    for g in range(N_GRAPHS):
        ka, kg = jax.random.split(ka)
        r = jax.random.uniform(kg, (npg, npg))
        a = (r < 0.25).astype(jnp.float32)
        a = jnp.maximum(a, a.T)                      # undirected, simple graph
        s = g * npg
        adj = adj.at[s:s + npg, s:s + npg].set(a)
    # self-loops (GATConv add_self_loops=True default)
    adj = adj.at[jnp.arange(N_NODES), jnp.arange(N_NODES)].set(1.0)

    batch = jnp.repeat(jnp.arange(N_GRAPHS), npg)                           # [N]
    seg = (batch[None, :] == jnp.arange(N_GRAPHS)[:, None]).astype(jnp.float32)
    return x, adj, batch, seg


# --------------------------------- main --------------------------------------
if __name__ == "__main__":
    key = jax.random.PRNGKey(0)
    k_params, k_graph = jax.random.split(key)

    params = init_params(k_params)
    x, adj, batch, seg = build_graph(k_graph)

    pred = gat_model_forward(x, adj, seg, params)    # [N_GRAPHS, 1]
    pred = jax.block_until_ready(pred)

    assert pred.shape == (N_GRAPHS, 1)
    assert bool(jnp.all(jnp.isfinite(pred)))
    print("KERNEL_OK")
</pallas_src>

<mosaic_0001>
module attributes {stable_mosaic.version = 11 : i64} {
  func.func @fused_gat_kernel(%arg0: memref<32x32xf32, #tpu.memory_space<vmem>>, %arg1: memref<3x32x32xf32, #tpu.memory_space<vmem>>, %arg2: memref<3x32x128xf32, #tpu.memory_space<vmem>>, %arg3: memref<3x32x128xf32, #tpu.memory_space<vmem>>, %arg4: memref<3x1x32xf32, #tpu.memory_space<vmem>>, %arg5: memref<32x128xf32, #tpu.memory_space<vmem>>, %arg6: memref<128x128xf32, #tpu.memory_space<vmem>>, %arg7: memref<32x128xf32, #tpu.memory_space<vmem>>, %arg8: memref<128x32xf32, #tpu.memory_space<vmem>>, %arg9: memref<8x32xf32, #tpu.memory_space<vmem>>, %arg10: memref<32x64xf32, #tpu.memory_space<vmem>>, %arg11: memref<1x64xf32, #tpu.memory_space<vmem>>, %arg12: memref<64x128xf32, #tpu.memory_space<vmem>>, %arg13: memref<1x128xf32, #tpu.memory_space<vmem>>, %arg14: memref<8x128xf32, #tpu.memory_space<vmem>>) attributes {dimension_semantics = [], scalar_prefetch = 0 : i64, scratch_operands = 0 : i64, tpu.core_type = #tpu.core_type<tc>} {
    %c0 = arith.constant 0 : index
    %c0_0 = arith.constant 0 : index
    %0 = vector.load %arg0[%c0, %c0_0] : memref<32x32xf32, #tpu.memory_space<vmem>>, vector<32x32xf32>
    %c0_1 = arith.constant 0 : index
    %c0_2 = arith.constant 0 : index
    %1 = vector.load %arg5[%c0_1, %c0_2] : memref<32x128xf32, #tpu.memory_space<vmem>>, vector<32x128xf32>
    %c0_3 = arith.constant 0 : index
    %c0_4 = arith.constant 0 : index
    %2 = vector.load %arg6[%c0_3, %c0_4] : memref<128x128xf32, #tpu.memory_space<vmem>>, vector<128x128xf32>
    %c0_5 = arith.constant 0 : index
    %c0_6 = arith.constant 0 : index
    %3 = vector.load %arg7[%c0_5, %c0_6] : memref<32x128xf32, #tpu.memory_space<vmem>>, vector<32x128xf32>
    %c0_7 = arith.constant 0 : index
    %c0_8 = arith.constant 0 : index
    %4 = vector.load %arg8[%c0_7, %c0_8] : memref<128x32xf32, #tpu.memory_space<vmem>>, vector<128x32xf32>
    %c0_9 = arith.constant 0 : index
    %c0_10 = arith.constant 0 : index
    %c0_11 = arith.constant 0 : index
    %5 = vector.load %arg1[%c0_9, %c0_10, %c0_11] : memref<3x32x32xf32, #tpu.memory_space<vmem>>, vector<1x32x32xf32>
    %6 = vector.shape_cast %5 : vector<1x32x32xf32> to vector<32x32xf32>
    %cst = arith.constant dense<0.000000e+00> : vector<32x32xf32>
    %7 = tpu.matmul %0, %6, %cst {dimension_numbers = #tpu.dot_dimension_numbers<[1], [0], [0], [1], [0, 0, 1, 1], [], []>} : vector<32x32xf32>, vector<32x32xf32>, vector<32x32xf32> -> vector<32x32xf32>
    %c0_12 = arith.constant 0 : index
    %c0_13 = arith.constant 0 : index
    %c0_14 = arith.constant 0 : index
    %8 = vector.load %arg3[%c0_12, %c0_13, %c0_14] : memref<3x32x128xf32, #tpu.memory_space<vmem>>, vector<1x32x128xf32>
    %9 = vector.shape_cast %8 : vector<1x32x128xf32> to vector<32x128xf32>
    %cst_15 = arith.constant dense<0.000000e+00> : vector<32x128xf32>
    %10 = tpu.matmul %7, %9, %cst_15 {dimension_numbers = #tpu.dot_dimension_numbers<[1], [0], [0], [1], [0, 0, 1, 1], [], []>} : vector<32x32xf32>, vector<32x128xf32>, vector<32x128xf32> -> vector<32x128xf32>
    %c0_16 = arith.constant 0 : index
    %c0_17 = arith.constant 0 : index
    %c0_18 = arith.constant 0 : index
    %11 = vector.load %arg2[%c0_16, %c0_17, %c0_18] : memref<3x32x128xf32, #tpu.memory_space<vmem>>, vector<1x32x128xf32>
    %12 = vector.shape_cast %11 : vector<1x32x128xf32> to vector<32x128xf32>
    %cst_19 = arith.constant dense<0.000000e+00> : vector<32x128xf32>
    %13 = tpu.matmul %7, %12, %cst_19 {dimension_numbers = #tpu.dot_dimension_numbers<[1], [0], [0], [1], [0, 0, 1, 1], [], []>} : vector<32x32xf32>, vector<32x128xf32>, vector<32x128xf32> -> vector<32x128xf32>
    %14 = arith.mulf %13, %1 : vector<32x128xf32>
    %cst_20 = arith.constant dense<0.000000e+00> : vector<128xf32>
    %15 = vector.multi_reduction <add>, %14, %cst_20 [0] : vector<32x128xf32> to vector<128xf32>
    %16 = vector.shape_cast %15 : vector<128xf32> to vector<1x128xf32>
    %17 = vector.broadcast %16 : vector<1x128xf32> to vector<32x128xf32>
    %18 = arith.addf %10, %17 : vector<32x128xf32>
    %cst_21 = arith.constant 0.000000e+00 : f32
    %19 = vector.broadcast %cst_21 : f32 to vector<32x128xf32>
    %20 = arith.cmpf ogt, %18, %19 : vector<32x128xf32>
    %cst_22 = arith.constant 2.000000e-01 : f32
    %21 = vector.broadcast %cst_22 : f32 to vector<32x128xf32>
    %22 = arith.mulf %21, %18 : vector<32x128xf32>
    %23 = arith.select %20, %18, %22 : vector<32x128xi1>, vector<32x128xf32>
    %24 = arith.addf %23, %3 : vector<32x128xf32>
    %cst_23 = arith.constant dense<0xFF800000> : vector<32xf32>
    %25 = vector.multi_reduction <maximumf>, %24, %cst_23 [1] : vector<32x128xf32> to vector<32xf32>
    %26 = vector.shape_cast %25 : vector<32xf32> to vector<32x1xf32>
    %27 = vector.broadcast %26 : vector<32x1xf32> to vector<32x128xf32>
    %28 = arith.subf %24, %27 : vector<32x128xf32>
    %29 = math.exp %28 : vector<32x128xf32>
    %cst_24 = arith.constant dense<0.000000e+00> : vector<32x128xf32>
    %30 = tpu.matmul %29, %2, %cst_24 {dimension_numbers = #tpu.dot_dimension_numbers<[1], [0], [0], [1], [0, 0, 1, 1], [], []>} : vector<32x128xf32>, vector<128x128xf32>, vector<32x128xf32> -> vector<32x128xf32>
    %cst_25 = arith.constant 1.000000e-30 : f32
    %31 = vector.broadcast %cst_25 : f32 to vector<32x128xf32>
    %32 = arith.maximumf %30, %31 : vector<32x128xf32>
    %33 = tpu.reciprocal %32 {approx = true} : vector<32x128xf32> -> vector<32x128xf32>
    %34 = arith.mulf %29, %33 : vector<32x128xf32>
    %35 = tpu.concatenate %7, %7, %7, %7 in 0 : vector<32x32xf32>, vector<32x32xf32>, vector<32x32xf32>, vector<32x32xf32> -> vector<128x32xf32>
    %36 = arith.mulf %35, %4 : vector<128x32xf32>
    %cst_26 = arith.constant dense<0.000000e+00> : vector<32x32xf32>
    %37 = tpu.matmul %34, %36, %cst_26 {dimension_numbers = #tpu.dot_dimension_numbers<[1], [0], [0], [1], [0, 0, 1, 1], [], []>} : vector<32x128xf32>, vector<128x32xf32>, vector<32x32xf32> -> vector<32x32xf32>
    %c0_27 = arith.constant 0 : index
    %c0_28 = arith.constant 0 : index
    %c0_29 = arith.constant 0 : index
    %38 = vector.load %arg4[%c0_27, %c0_28, %c0_29] : memref<3x1x32xf32, #tpu.memory_space<vmem>>, vector<1x1x32xf32>
    %39 = vector.shape_cast %38 : vector<1x1x32xf32> to vector<1x32xf32>
    %40 = vector.broadcast %39 : vector<1x32xf32> to vector<32x32xf32>
    %41 = arith.addf %37, %40 : vector<32x32xf32>
    %cst_30 = arith.constant 0.000000e+00 : f32
    %42 = vector.broadcast %cst_30 : f32 to vector<32x32xf32>
    %43 = arith.maximumf %41, %42 : vector<32x32xf32>
    %c1 = arith.constant 1 : index
    %c0_31 = arith.constant 0 : index
    %c0_32 = arith.constant 0 : index
    %44 = vector.load %arg1[%c1, %c0_31, %c0_32] : memref<3x32x32xf32, #tpu.memory_space<vmem>>, vector<1x32x32xf32>
    %45 = vector.shape_cast %44 : vector<1x32x32xf32> to vector<32x32xf32>
    %cst_33 = arith.constant dense<0.000000e+00> : vector<32x32xf32>
    %46 = tpu.matmul %43, %45, %cst_33 {dimension_numbers = #tpu.dot_dimension_numbers<[1], [0], [0], [1], [0, 0, 1, 1], [], []>} : vector<32x32xf32>, vector<32x32xf32>, vector<32x32xf32> -> vector<32x32xf32>
    %c1_34 = arith.constant 1 : index
    %c0_35 = arith.constant 0 : index
    %c0_36 = arith.constant 0 : index
    %47 = vector.load %arg3[%c1_34, %c0_35, %c0_36] : memref<3x32x128xf32, #tpu.memory_space<vmem>>, vector<1x32x128xf32>
    %48 = vector.shape_cast %47 : vector<1x32x128xf32> to vector<32x128xf32>
    %cst_37 = arith.constant dense<0.000000e+00> : vector<32x128xf32>
    %49 = tpu.matmul %46, %48, %cst_37 {dimension_numbers = #tpu.dot_dimension_numbers<[1], [0], [0], [1], [0, 0, 1, 1], [], []>} : vector<32x32xf32>, vector<32x128xf32>, vector<32x128xf32> -> vector<32x128xf32>
    %c1_38 = arith.constant 1 : index
    %c0_39 = arith.constant 0 : index
    %c0_40 = arith.constant 0 : index
    %50 = vector.load %arg2[%c1_38, %c0_39, %c0_40] : memref<3x32x128xf32, #tpu.memory_space<vmem>>, vector<1x32x128xf32>
    %51 = vector.shape_cast %50 : vector<1x32x128xf32> to vector<32x128xf32>
    %cst_41 = arith.constant dense<0.000000e+00> : vector<32x128xf32>
    %52 = tpu.matmul %46, %51, %cst_41 {dimension_numbers = #tpu.dot_dimension_numbers<[1], [0], [0], [1], [0, 0, 1, 1], [], []>} : vector<32x32xf32>, vector<32x128xf32>, vector<32x128xf32> -> vector<32x128xf32>
    %53 = arith.mulf %52, %1 : vector<32x128xf32>
    %cst_42 = arith.constant dense<0.000000e+00> : vector<128xf32>
    %54 = vector.multi_reduction <add>, %53, %cst_42 [0] : vector<32x128xf32> to vector<128xf32>
    %55 = vector.shape_cast %54 : vector<128xf32> to vector<1x128xf32>
    %56 = vector.broadcast %55 : vector<1x128xf32> to vector<32x128xf32>
    %57 = arith.addf %49, %56 : vector<32x128xf32>
    %cst_43 = arith.constant 0.000000e+00 : f32
    %58 = vector.broadcast %cst_43 : f32 to vector<32x128xf32>
    %59 = arith.cmpf ogt, %57, %58 : vector<32x128xf32>
    %cst_44 = arith.constant 2.000000e-01 : f32
    %60 = vector.broadcast %cst_44 : f32 to vector<32x128xf32>
    %61 = arith.mulf %60, %57 : vector<32x128xf32>
    %62 = arith.select %59, %57, %61 : vector<32x128xi1>, vector<32x128xf32>
    %63 = arith.addf %62, %3 : vector<32x128xf32>
    %cst_45 = arith.constant dense<0xFF800000> : vector<32xf32>
    %64 = vector.multi_reduction <maximumf>, %63, %cst_45 [1] : vector<32x128xf32> to vector<32xf32>
    %65 = vector.shape_cast %64 : vector<32xf32> to vector<32x1xf32>
    %66 = vector.broadcast %65 : vector<32x1xf32> to vector<32x128xf32>
    %67 = arith.subf %63, %66 : vector<32x128xf32>
    %68 = math.exp %67 : vector<32x128xf32>
    %cst_46 = arith.constant dense<0.000000e+00> : vector<32x128xf32>
    %69 = tpu.matmul %68, %2, %cst_46 {dimension_numbers = #tpu.dot_dimension_numbers<[1], [0], [0], [1], [0, 0, 1, 1], [], []>} : vector<32x128xf32>, vector<128x128xf32>, vector<32x128xf32> -> vector<32x128xf32>
    %cst_47 = arith.constant 1.000000e-30 : f32
    %70 = vector.broadcast %cst_47 : f32 to vector<32x128xf32>
    %71 = arith.maximumf %69, %70 : vector<32x128xf32>
    %72 = tpu.reciprocal %71 {approx = true} : vector<32x128xf32> -> vector<32x128xf32>
    %73 = arith.mulf %68, %72 : vector<32x128xf32>
    %74 = tpu.concatenate %46, %46, %46, %46 in 0 : vector<32x32xf32>, vector<32x32xf32>, vector<32x32xf32>, vector<32x32xf32> -> vector<128x32xf32>
    %75 = arith.mulf %74, %4 : vector<128x32xf32>
    %cst_48 = arith.constant dense<0.000000e+00> : vector<32x32xf32>
    %76 = tpu.matmul %73, %75, %cst_48 {dimension_numbers = #tpu.dot_dimension_numbers<[1], [0], [0], [1], [0, 0, 1, 1], [], []>} : vector<32x128xf32>, vector<128x32xf32>, vector<32x32xf32> -> vector<32x32xf32>
    %c1_49 = arith.constant 1 : index
    %c0_50 = arith.constant 0 : index
    %c0_51 = arith.constant 0 : index
    %77 = vector.load %arg4[%c1_49, %c0_50, %c0_51] : memref<3x1x32xf32, #tpu.memory_space<vmem>>, vector<1x1x32xf32>
    %78 = vector.shape_cast %77 : vector<1x1x32xf32> to vector<1x32xf32>
    %79 = vector.broadcast %78 : vector<1x32xf32> to vector<32x32xf32>
    %80 = arith.addf %76, %79 : vector<32x32xf32>
    %cst_52 = arith.constant 0.000000e+00 : f32
    %81 = vector.broadcast %cst_52 : f32 to vector<32x32xf32>
    %82 = arith.maximumf %80, %81 : vector<32x32xf32>
    %c2 = arith.constant 2 : index
    %c0_53 = arith.constant 0 : index
    %c0_54 = arith.constant 0 : index
    %83 = vector.load %arg1[%c2, %c0_53, %c0_54] : memref<3x32x32xf32, #tpu.memory_space<vmem>>, vector<1x32x32xf32>
    %84 = vector.shape_cast %83 : vector<1x32x32xf32> to vector<32x32xf32>
    %cst_55 = arith.constant dense<0.000000e+00> : vector<32x32xf32>
    %85 = tpu.matmul %82, %84, %cst_55 {dimension_numbers = #tpu.dot_dimension_numbers<[1], [0], [0], [1], [0, 0, 1, 1], [], []>} : vector<32x32xf32>, vector<32x32xf32>, vector<32x32xf32> -> vector<32x32xf32>
    %c2_56 = arith.constant 2 : index
    %c0_57 = arith.constant 0 : index
    %c0_58 = arith.constant 0 : index
    %86 = vector.load %arg3[%c2_56, %c0_57, %c0_58] : memref<3x32x128xf32, #tpu.memory_space<vmem>>, vector<1x32x128xf32>
    %87 = vector.shape_cast %86 : vector<1x32x128xf32> to vector<32x128xf32>
    %cst_59 = arith.constant dense<0.000000e+00> : vector<32x128xf32>
    %88 = tpu.matmul %85, %87, %cst_59 {dimension_numbers = #tpu.dot_dimension_numbers<[1], [0], [0], [1], [0, 0, 1, 1], [], []>} : vector<32x32xf32>, vector<32x128xf32>, vector<32x128xf32> -> vector<32x128xf32>
    %c2_60 = arith.constant 2 : index
    %c0_61 = arith.constant 0 : index
    %c0_62 = arith.constant 0 : index
    %89 = vector.load %arg2[%c2_60, %c0_61, %c0_62] : memref<3x32x128xf32, #tpu.memory_space<vmem>>, vector<1x32x128xf32>
    %90 = vector.shape_cast %89 : vector<1x32x128xf32> to vector<32x128xf32>
    %cst_63 = arith.constant dense<0.000000e+00> : vector<32x128xf32>
    %91 = tpu.matmul %85, %90, %cst_63 {dimension_numbers = #tpu.dot_dimension_numbers<[1], [0], [0], [1], [0, 0, 1, 1], [], []>} : vector<32x32xf32>, vector<32x128xf32>, vector<32x128xf32> -> vector<32x128xf32>
    %92 = arith.mulf %91, %1 : vector<32x128xf32>
    %cst_64 = arith.constant dense<0.000000e+00> : vector<128xf32>
    %93 = vector.multi_reduction <add>, %92, %cst_64 [0] : vector<32x128xf32> to vector<128xf32>
    %94 = vector.shape_cast %93 : vector<128xf32> to vector<1x128xf32>
    %95 = vector.broadcast %94 : vector<1x128xf32> to vector<32x128xf32>
    %96 = arith.addf %88, %95 : vector<32x128xf32>
    %cst_65 = arith.constant 0.000000e+00 : f32
    %97 = vector.broadcast %cst_65 : f32 to vector<32x128xf32>
    %98 = arith.cmpf ogt, %96, %97 : vector<32x128xf32>
    %cst_66 = arith.constant 2.000000e-01 : f32
    %99 = vector.broadcast %cst_66 : f32 to vector<32x128xf32>
    %100 = arith.mulf %99, %96 : vector<32x128xf32>
    %101 = arith.select %98, %96, %100 : vector<32x128xi1>, vector<32x128xf32>
    %102 = arith.addf %101, %3 : vector<32x128xf32>
    %cst_67 = arith.constant dense<0xFF800000> : vector<32xf32>
    %103 = vector.multi_reduction <maximumf>, %102, %cst_67 [1] : vector<32x128xf32> to vector<32xf32>
    %104 = vector.shape_cast %103 : vector<32xf32> to vector<32x1xf32>
    %105 = vector.broadcast %104 : vector<32x1xf32> to vector<32x128xf32>
    %106 = arith.subf %102, %105 : vector<32x128xf32>
    %107 = math.exp %106 : vector<32x128xf32>
    %cst_68 = arith.constant dense<0.000000e+00> : vector<32x128xf32>
    %108 = tpu.matmul %107, %2, %cst_68 {dimension_numbers = #tpu.dot_dimension_numbers<[1], [0], [0], [1], [0, 0, 1, 1], [], []>} : vector<32x128xf32>, vector<128x128xf32>, vector<32x128xf32> -> vector<32x128xf32>
    %cst_69 = arith.constant 1.000000e-30 : f32
    %109 = vector.broadcast %cst_69 : f32 to vector<32x128xf32>
    %110 = arith.maximumf %108, %109 : vector<32x128xf32>
    %111 = tpu.reciprocal %110 {approx = true} : vector<32x128xf32> -> vector<32x128xf32>
    %112 = arith.mulf %107, %111 : vector<32x128xf32>
    %113 = tpu.concatenate %85, %85, %85, %85 in 0 : vector<32x32xf32>, vector<32x32xf32>, vector<32x32xf32>, vector<32x32xf32> -> vector<128x32xf32>
    %114 = arith.mulf %113, %4 : vector<128x32xf32>
    %cst_70 = arith.constant dense<0.000000e+00> : vector<32x32xf32>
    %115 = tpu.matmul %112, %114, %cst_70 {dimension_numbers = #tpu.dot_dimension_numbers<[1], [0], [0], [1], [0, 0, 1, 1], [], []>} : vector<32x128xf32>, vector<128x32xf32>, vector<32x32xf32> -> vector<32x32xf32>
    %c2_71 = arith.constant 2 : index
    %c0_72 = arith.constant 0 : index
    %c0_73 = arith.constant 0 : index
    %116 = vector.load %arg4[%c2_71, %c0_72, %c0_73] : memref<3x1x32xf32, #tpu.memory_space<vmem>>, vector<1x1x32xf32>
    %117 = vector.shape_cast %116 : vector<1x1x32xf32> to vector<1x32xf32>
    %118 = vector.broadcast %117 : vector<1x32xf32> to vector<32x32xf32>
    %119 = arith.addf %115, %118 : vector<32x32xf32>
    %c0_74 = arith.constant 0 : index
    %c0_75 = arith.constant 0 : index
    %120 = vector.load %arg9[%c0_74, %c0_75] : memref<8x32xf32, #tpu.memory_space<vmem>>, vector<8x32xf32>
    %cst_76 = arith.constant dense<0.000000e+00> : vector<8x32xf32>
    %121 = tpu.matmul %120, %119, %cst_76 {dimension_numbers = #tpu.dot_dimension_numbers<[1], [0], [0], [1], [0, 0, 1, 1], [], []>} : vector<8x32xf32>, vector<32x32xf32>, vector<8x32xf32> -> vector<8x32xf32>
    %c0_77 = arith.constant 0 : index
    %c0_78 = arith.constant 0 : index
    %122 = vector.load %arg10[%c0_77, %c0_78] : memref<32x64xf32, #tpu.memory_space<vmem>>, vector<32x64xf32>
    %cst_79 = arith.constant dense<0.000000e+00> : vector<8x64xf32>
    %123 = tpu.matmul %121, %122, %cst_79 {dimension_numbers = #tpu.dot_dimension_numbers<[1], [0], [0], [1], [0, 0, 1, 1], [], []>} : vector<8x32xf32>, vector<32x64xf32>, vector<8x64xf32> -> vector<8x64xf32>
    %c0_80 = arith.constant 0 : index
    %c0_81 = arith.constant 0 : index
    %124 = vector.load %arg11[%c0_80, %c0_81] : memref<1x64xf32, #tpu.memory_space<vmem>>, vector<1x64xf32>
    %125 = vector.broadcast %124 : vector<1x64xf32> to vector<8x64xf32>
    %126 = arith.addf %123, %125 : vector<8x64xf32>
    %cst_82 = arith.constant 0.000000e+00 : f32
    %127 = vector.broadcast %cst_82 : f32 to vector<8x64xf32>
    %128 = arith.maximumf %126, %127 : vector<8x64xf32>
    %c0_83 = arith.constant 0 : index
    %c0_84 = arith.constant 0 : index
    %129 = vector.load %arg12[%c0_83, %c0_84] : memref<64x128xf32, #tpu.memory_space<vmem>>, vector<64x128xf32>
    %cst_85 = arith.constant dense<0.000000e+00> : vector<8x128xf32>
    %130 = tpu.matmul %128, %129, %cst_85 {dimension_numbers = #tpu.dot_dimension_numbers<[1], [0], [0], [1], [0, 0, 1, 1], [], []>} : vector<8x64xf32>, vector<64x128xf32>, vector<8x128xf32> -> vector<8x128xf32>
    %c0_86 = arith.constant 0 : index
    %c0_87 = arith.constant 0 : index
    %131 = vector.load %arg13[%c0_86, %c0_87] : memref<1x128xf32, #tpu.memory_space<vmem>>, vector<1x128xf32>
    %132 = vector.broadcast %131 : vector<1x128xf32> to vector<8x128xf32>
    %133 = arith.addf %130, %132 : vector<8x128xf32>
    %c0_88 = arith.constant 0 : index
    %c0_89 = arith.constant 0 : index
    %134 = vector.load %arg14[%c0_88, %c0_89] : memref<8x128xf32, #tpu.memory_space<vmem>>, vector<8x128xf32>
    tpu.vector_store %arg14[%c0_88, %c0_89], %133 {strides = array<i32>} : memref<8x128xf32, #tpu.memory_space<vmem>>, vector<8x128xf32>,
    return
  }
}

</mosaic_0001>

<bundles_post_ra>
// kernel: tpu_custom_call.1
= control target key start
LH: loop header
LB: loop body
LE: loop exit
PB: predicated region body
PF: predicated region fallthrough
CT: control target
= control target key end

     0   :  { %19 = vsyncpa [#allocation3], 0  ;;  %s1960_s0 = inlined_call_operand.vmem [shape: f32[32,32], index: 0, kind: input, shape index: {}]   ;;  %s1961_s1 = inlined_call_operand.hbm [shape: f32[3,32,32], index: 1, kind: input, shape index: {}]   ;;  %s1962_s2 = inlined_call_operand.hbm [shape: f32[3,32,128], index: 2, kind: input, shape index: {}]   ;;  %s1963_s3 = inlined_call_operand.hbm [shape: f32[3,32,128], index: 3, kind: input, shape index: {}]   ;;  %s1964_s4 = inlined_call_operand.vmem [shape: f32[3,1,32], index: 4, kind: input, shape index: {}]   ;;  %s1965_s5 = inlined_call_operand.hbm [shape: f32[32,128], index: 5, kind: input, shape index: {}]   ;;  %s1966_s6 = inlined_call_operand.vmem [shape: f32[128,128], index: 6, kind: input, shape index: {}]   ;;  %s1967_s7 = inlined_call_operand.hbm [shape: f32[32,128], index: 7, kind: input, shape index: {}]   ;;  %s1968_s8 = inlined_call_operand.vmem [shape: f32[128,32], index: 8, kind: input, shape index: {}]   ;;  %s1969_s9 = inlined_call_operand.hbm [shape: f32[8,32], index: 9, kind: input, shape index: {}]   ;;  %s1970_s10 = inlined_call_operand.hbm [shape: f32[32,64], index: 10, kind: input, shape index: {}]   ;;  %s1971_s11 = inlined_call_operand.vmem [shape: f32[1,64], index: 11, kind: input, shape index: {}]   ;;  %s1972_s12 = inlined_call_operand.hbm [shape: f32[64,128], index: 12, kind: input, shape index: {}]   ;;  %s1973_s13 = inlined_call_operand.vmem [shape: f32[1,128], index: 13, kind: input, shape index: {}]   ;;  %s1974_s14 = inlined_call_operand.hbm [shape: f32[8,128], index: 14, kind: output, shape index: {}]  }
   0x1   :  { %20 = vsyncpa [#allocation6], 0 }
   0x2   :  { %21 = vsyncpa [#allocation9], 0 }
   0x3   :  { %22 = vsyncpa [#allocation12], 0 }
   0x4   :  { %23 = vsyncpa [#allocation15], 0 }
   0x5   :  { %24 = vsyncpa [#allocation4], 0  ;;  %s44_s15 = sshll.u32 %s1962_s2, 4  ;;  %s1465_s16 = smov [#allocation5]   ;;  %s45_s15 = int_to_ptr.hbm [resolvable:$true] %s44_s15 }
   0x6   :  { %s46_s17 = sshll.u32 %s1465_s16, 4  ;;  %s72_s20 = sshll.u32 %s1965_s5, 4  ;;  %s47_s17 = int_to_ptr.vmem [resolvable:$true] %s46_s17  ;;  %s73_s20 = int_to_ptr.hbm [resolvable:$true] %s72_s20 }
   0x7   :  { %s1466_s21 = smov 128   ;;  %s1467_s22 = smov 8  }
   0x8   :  { %52 = dma.hbm_to_vmem [thread:$0]  %s45_s15, 1536, %s47_s17, [#allocation6], %s1466_s21, %s1466_s21, %s1467_s22  }
   0x9   :  { %s1468_s23 = smov [#allocation8]   ;;  %s103_s2 = sshll.u32 %s1969_s9, 4  ;;  %s104_s2 = int_to_ptr.hbm [resolvable:$true] %s103_s2 }
   0xa   :  { %s74_s24 = sshll.u32 %s1468_s23, 4  ;;  %s31_s28 = sshll.u32 %s1961_s1, 4  ;;  %s75_s24 = int_to_ptr.vmem [resolvable:$true] %s74_s24  ;;  %s32_s28 = int_to_ptr.hbm [resolvable:$true] %s31_s28 }
   0xb   :  { %80 = dma.hbm_to_vmem [thread:$0]  %s73_s20, 512, %s75_s24, [#allocation9], %s1466_s21, %s1466_s21, %s1467_s22  }
   0xc   :  { %s1469_s29 = smov [#allocation11]   ;;  %s1470_s15 = smov [#allocation2]  }
   0xd   :  { %s105_s30 = sshll.u32 %s1469_s29, 4  ;;  %s33_s16 = sshll.u32 %s1470_s15, 4  ;;  %s106_s30 = int_to_ptr.vmem [resolvable:$true] %s105_s30  ;;  %s34_s16 = int_to_ptr.vmem [resolvable:$true] %s33_s16 }
   0xe   :  { %108 = dma.hbm_to_vmem [thread:$0]  %s104_s2, 128, %s106_s30, [#allocation12]  }
   0xf   :  { %s57_s9 = sshll.u32 %s1963_s3, 4  ;;  %s87_s1 = sshll.u32 %s1967_s7, 4  ;;  %s58_s9 = int_to_ptr.hbm [resolvable:$true] %s57_s9  ;;  %s88_s1 = int_to_ptr.hbm [resolvable:$true] %s87_s1 }
  0x10   :  { %39 = dma.hbm_to_vmem [thread:$0]  %s32_s28, 1536, %s34_s16, [#allocation3], %s1466_s21, %s1466_s21, %s1467_s22  }
  0x11   :  { %s1471_s23 = smov [#allocation7]   ;;  %s1472_s25 = smov [#allocation10]  }
  0x12   :  { %s59_s24 = sshll.u32 %s1471_s23, 4  ;;  %s89_s3 = sshll.u32 %s1472_s25, 4  ;;  %s60_s24 = int_to_ptr.vmem [resolvable:$true] %s59_s24  ;;  %s90_s3 = int_to_ptr.vmem [resolvable:$true] %s89_s3 }
  0x13   :  { %65 = dma.hbm_to_vmem [thread:$0]  %s58_s9, 1536, %s60_s24, [#allocation6], %s1466_s21, %s1466_s21, %s1467_s22  }
  0x14   :  { %s113_s5 = sshll.u32 %s1970_s10, 4  ;;  %s128_s28 = sshll.u32 %s1972_s12, 4  ;;  %s114_s5 = int_to_ptr.hbm [resolvable:$true] %s113_s5  ;;  %s129_s28 = int_to_ptr.hbm [resolvable:$true] %s128_s28 }
  0x15   :  { %95 = dma.hbm_to_vmem [thread:$0]  %s88_s1, 512, %s90_s3, [#allocation9], %s1466_s21, %s1466_s21, %s1467_s22  }
  0x16   :  { %s1473_s29 = smov [#allocation13]   ;;  %s1474_s15 = smov [#allocation14]  }
  0x17   :  { %s115_s30 = sshll.u32 %s1473_s29, 4  ;;  %s130_s10 = sshll.u32 %s1474_s15, 4  ;;  %s116_s30 = int_to_ptr.vmem [resolvable:$true] %s115_s30  ;;  %s131_s10 = int_to_ptr.vmem [resolvable:$true] %s130_s10 }
  0x18   :  { %121 = dma.hbm_to_vmem [thread:$0]  %s114_s5, 512, %s116_s30, [#allocation12], %s1466_s21, %s1466_s21, %s1467_s22  }
  0x19   :  { %136 = dma.hbm_to_vmem [thread:$0]  %s129_s28, 1024, %s131_s10, [#allocation15], %s1466_s21, %s1466_s21, %s1467_s22  }
  0x1a   :  { %1453 = dma.done.wait [#allocation3], 1536  }
  0x1b   :  { %1454 = vsyncadd [#allocation3], 4294965760 }
  0x1c   :  { %1455 = dma.done.wait [#allocation6], 3072  }
  0x1d   :  { %1456 = vsyncadd [#allocation6], 4294964224 }
  0x1e   :  { %1457 = dma.done.wait [#allocation9], 1024  }
  0x1f   :  { %1458 = vsyncadd [#allocation9], 4294966272 }
  0x20   :  { %1459 = dma.done.wait [#allocation12], 640  }
  0x21   :  { %1460 = vsyncadd [#allocation12], 4294966656 }
  0x22   :  { %1461 = dma.done.wait [#allocation15], 1024  }
  0x23   :  { %1462 = vsyncadd [#allocation15], 4294966272  ;;  %v218_v0 = vld [vmem:[#allocation2 + $0x18] sm:$0xff]  ;;  %v217_v1 = vld [vmem:[#allocation2 + $0x10] sm:$0xff]  ;;  %vm219_vm0 = vcmask 261120   ;;  %vm1086_vm13 = vcmask 523264  }
  0x24   :  { %244 = vmatpush.msra.mxu0 %v218_v0  ;;  %v216_v2 = vld [vmem:[#allocation2 + $0x8] sm:$0xff]  ;;  %v215_v3 = vld [vmem:[#allocation2] sm:$0xff]  ;;  %v268_v4 = vld [vmem:[#allocation5 + $0x18] sm:$0xff]  ;;  %s1475_s22 = smov [#allocation16]   ;;  %s1118_s19 = sshll.u32 %s1974_s14, 4  ;;  %s1119_s19 = int_to_ptr.hbm [resolvable:$true] %s1118_s19 }
  0x25   :  { %v171_v5 = vld [vmem:[%s1960_s0] sm:$0xff]  ;;  %293 = vmatpush.msra.mxu1 %v268_v4  ;;  %v264_v6 = vld [vmem:[#allocation7 + $0x18] sm:$0xff]  ;;  %v267_v7 = vld [vmem:[#allocation5 + $0x10] sm:$0xff]  ;;  %s1116_s17 = sshll.u32 %s1475_s22, 4  ;;  %s1117_s17 = int_to_ptr.vmem [resolvable:$true] %s1116_s17 }
  0x26   :  { %245 = vmatpush.msra.mxu0 %v217_v1  ;;  %v263_v8 = vld [vmem:[#allocation7 + $0x10] sm:$0xff]  ;;  %335 = vmatpush.msra.mxu2 %v264_v6  ;;  %v266_v9 = vld [vmem:[#allocation5 + $0x8] sm:$0xff]  ;;  %v174_v13 = vld [vmem:[%s1960_s0 + $0x18] sm:$0xff] }
  0x27   :  { %v262_v10 = vld [vmem:[#allocation7 + $0x8] sm:$0xff]  ;;  %294 = vmatpush.msra.mxu1 %v267_v7  ;;  %v173_v12 = vld [vmem:[%s1960_s0 + $0x10] sm:$0xff]  ;;  %v265_v14 = vld [vmem:[#allocation5] sm:$0xff] }
  0x28   :  { %246 = vmatpush.msra.mxu0 %v216_v2  ;;  %336 = vmatpush.msra.mxu2 %v263_v8  ;;  %v172_v11 = vld [vmem:[%s1960_s0 + $0x8] sm:$0xff]  ;;  %v261_v15 = vld [vmem:[#allocation7] sm:$0xff]  ;;  %v1621_v19 = vld [vmem:[%s1968_s8 + $0x78] sm:$0xff] }
  0x29   :  { %295 = vmatpush.msra.mxu1 %v266_v9  ;;  %v1626_v21 = vld [vmem:[%s1968_s8 + $0x70] sm:$0xff]  ;;  %v1634_v23 = vld [vmem:[%s1968_s8 + $0x68] sm:$0xff]  ;;  %v1640_v25 = vld [vmem:[%s1968_s8 + $0x60] sm:$0xff] }
  0x2a   :  { %247 = vmatpush.msra.mxu0 %v215_v3  ;;  %337 = vmatpush.msra.mxu2 %v262_v10  ;;  %v1646_v27 = vld [vmem:[%s1968_s8 + $0x58] sm:$0xff]  ;;  %v1652_v29 = vld [vmem:[%s1968_s8 + $0x50] sm:$0xff]  ;;  %v1658_v31 = vld [vmem:[%s1968_s8 + $0x48] sm:$0xff] }
  0x2b   :  { %1132 = vmatmul.msk.f32.vlgmr.msra.gmra.mxu0 %vm219_vm0, %v171_v5  ;;  %296 = vmatpush.msra.mxu1 %v265_v14  ;;  %v1664_v33 = vld [vmem:[%s1968_s8 + $0x40] sm:$0xff]  ;;  %v1670_v35 = vld [vmem:[%s1968_s8 + $0x38] sm:$0xff]  ;;  %v1676_v37 = vld [vmem:[%s1968_s8 + $0x30] sm:$0xff] }
  0x2c   :  { %338 = vmatpush.msra.mxu2 %v261_v15  ;;  %v1682_v39 = vld [vmem:[%s1968_s8 + $0x28] sm:$0xff]  ;;  %v1688_v41 = vld [vmem:[%s1968_s8 + $0x20] sm:$0xff]  ;;  %v1694_v43 = vld [vmem:[%s1968_s8 + $0x18] sm:$0xff] }
  0x2d   :  { %v1700_v45 = vld [vmem:[%s1968_s8 + $0x10] sm:$0xff]  ;;  %v1706_v47 = vld [vmem:[%s1968_s8 + $0x8] sm:$0xff]  ;;  %v1712_v49 = vld [vmem:[%s1968_s8] sm:$0xff] }
  0x2e   :  { %v1716_v55 = vld [vmem:[#allocation8 + $0x8] sm:$0xff]  ;;  %v1718_v57 = vld [vmem:[#allocation8] sm:$0xff]  ;;  %v1720_v58 = vld [vmem:[#allocation8 + $0x10] sm:$0xff] }
  0x2f   :  { %v1725_v63 = vld [vmem:[#allocation8 + $0x18] sm:$0xff]  ;;  %v1736_v5 = vld [vmem:[%s1966_s6 + $0x70] sm:$0xff]  ;;  %v1743_v7 = vld [vmem:[%s1966_s6 + $0x68] sm:$0xff] }
  0x30   :  { %v1731_v4 = vld [vmem:[%s1966_s6 + $0x78] sm:$0xff]  ;;  %v1750_v9 = vld [vmem:[%s1966_s6 + $0x60] sm:$0xff]  ;;  %v1764_v14 = vld [vmem:[%s1966_s6 + $0x50] sm:$0xff] }
  0x31   :  { %388 = vmatpush.msra.mxu3 %v1731_v4 }
  0x33   :  { %1133 = vmatmul.msk.f32.gmra.mxu0 %vm219_vm0, %v172_v11  ;;  %389 = vmatpush.msra.mxu3 %v1736_v5  ;;  %v1757_v11 = vld [vmem:[%s1966_s6 + $0x58] sm:$0xff] }
  0x35   :  { %390 = vmatpush.msra.mxu3 %v1743_v7 }
  0x37   :  { %391 = vmatpush.msra.mxu3 %v1750_v9 }
  0x39   :  { %392 = vmatpush.msra.mxu3 %v1757_v11 }
  0x3b   :  { %1134 = vmatmul.msk.f32.gmra.mxu0 %vm219_vm0, %v173_v12  ;;  %393 = vmatpush.msra.mxu3 %v1764_v14 }
  0x43   :  { %1135 = vmatmul.msk.f32.gmra.mxu0 %vm219_vm0, %v174_v13 }
  0xa8   :  { %v249_v16 = vpop.f32.mrf.mxu0 }
  0xa9   :  { %1136 = vmatmul.msk.f32.vlgmr.msra.gmra.mxu1 %vm219_vm0, %v249_v16  ;;  %1140 = vmatmul.msk.f32.vlgmr.msra.gmra.mxu2 %vm219_vm0, %v249_v16  ;;  %v441_v28 = vmul.f32 %v249_v16, %v1640_v25  ;;  %v437_v36 = vmul.f32 %v249_v16, %v1664_v33  ;;  %v433_v44 = vmul.f32 %v249_v16, %v1688_v41 }
  0xaa   :  { %v429_v51 = vmul.f32 %v249_v16, %v1712_v49  ;;  %v1771_v16 = vld [vmem:[%s1966_s6 + $0x48] sm:$0xff] }
  0xab   :  { %394 = vmatpush.msra.mxu3 %v1771_v16 }
  0xb0   :  { %v252_v17 = vpop.f32.mrf.mxu0 }
  0xb1   :  { %1137 = vmatmul.msk.f32.gmra.mxu1 %vm219_vm0, %v252_v17  ;;  %1141 = vmatmul.msk.f32.gmra.mxu2 %vm219_vm0, %v252_v17  ;;  %v442_v26 = vmul.f32 %v252_v17, %v1634_v23  ;;  %v438_v34 = vmul.f32 %v252_v17, %v1658_v31  ;;  %v434_v42 = vmul.f32 %v252_v17, %v1682_v39 }
  0xb2   :  { %v430_v50 = vmul.f32 %v252_v17, %v1706_v47 }
  0xb8   :  { %v255_v18 = vpop.f32.mrf.mxu0 }
  0xb9   :  { %1138 = vmatmul.msk.f32.gmra.mxu1 %vm219_vm0, %v255_v18  ;;  %1142 = vmatmul.msk.f32.gmra.mxu2 %vm219_vm0, %v255_v18  ;;  %v443_v24 = vmul.f32 %v255_v18, %v1626_v21  ;;  %v439_v32 = vmul.f32 %v255_v18, %v1652_v29  ;;  %v435_v40 = vmul.f32 %v255_v18, %v1676_v37 }
  0xba   :  { %v431_v48 = vmul.f32 %v255_v18, %v1700_v45  ;;  %v1778_v18 = vld [vmem:[%s1966_s6 + $0x40] sm:$0xff] }
  0xbb   :  { %395 = vmatpush.msra.mxu3 %v1778_v18 }
  0xc0   :  { %v258_v20 = vpop.f32.mrf.mxu0 }
  0xc1   :  { %1139 = vmatmul.msk.f32.gmra.mxu1 %vm219_vm0, %v258_v20  ;;  %1143 = vmatmul.msk.f32.gmra.mxu2 %vm219_vm0, %v258_v20  ;;  %v444_v22 = vmul.f32 %v258_v20, %v1621_v19  ;;  %v440_v30 = vmul.f32 %v258_v20, %v1646_v27  ;;  %v436_v38 = vmul.f32 %v258_v20, %v1670_v35 }
  0xc2   :  { %v432_v46 = vmul.f32 %v258_v20, %v1694_v43 }
  0xc3   :  { %449 = vmatpush.msrb.mxu0 %v444_v22  ;;  %v1785_v22 = vld [vmem:[%s1966_s6 + $0x38] sm:$0xff] }
  0xc4   :  { %396 = vmatpush.msra.mxu3 %v1785_v22 }
  0xc5   :  { %450 = vmatpush.msrb.mxu0 %v443_v24 }
  0xc7   :  { %451 = vmatpush.msrb.mxu0 %v442_v26 }
  0xc9   :  { %452 = vmatpush.msrb.mxu0 %v441_v28  ;;  %v1792_v28 = vld [vmem:[%s1966_s6 + $0x30] sm:$0xff] }
  0xca   :  { %397 = vmatpush.msra.mxu3 %v1792_v28 }
  0xcb   :  { %453 = vmatpush.msrb.mxu0 %v440_v30 }
  0xcd   :  { %454 = vmatpush.msrb.mxu0 %v439_v32 }
  0xcf   :  { %455 = vmatpush.msrb.mxu0 %v438_v34  ;;  %v1796_v34 = vld [vmem:[#allocation10 + $0x10] sm:$0xff] }
  0xd1   :  { %456 = vmatpush.msrb.mxu0 %v437_v36 }
  0xd3   :  { %457 = vmatpush.msrb.mxu0 %v436_v38  ;;  %v1798_v38 = vld [vmem:[#allocation10] sm:$0xff] }
  0xd5   :  { %458 = vmatpush.msrb.mxu0 %v435_v40 }
  0xd7   :  { %459 = vmatpush.msrb.mxu0 %v434_v42 }
  0xd9   :  { %460 = vmatpush.msrb.mxu0 %v433_v44 }
  0xdb   :  { %461 = vmatpush.msrb.mxu0 %v432_v46 }
  0xdd   :  { %462 = vmatpush.msrb.mxu0 %v431_v48 }
  0xdf   :  { %463 = vmatpush.msrb.mxu0 %v430_v50 }
  0xe1   :  { %464 = vmatpush.msrb.mxu0 %v429_v51 }
  0xe3   :  { %657 = vmatpush.msra.mxu0 %v1731_v4 }
  0xe5   :  { %658 = vmatpush.msra.mxu0 %v1736_v5 }
  0xe7   :  { %659 = vmatpush.msra.mxu0 %v1743_v7 }
  0xe9   :  { %660 = vmatpush.msra.mxu0 %v1750_v9 }
  0xeb   :  { %661 = vmatpush.msra.mxu0 %v1757_v11 }
  0xed   :  { %662 = vmatpush.msra.mxu0 %v1764_v14 }
  0xef   :  { %663 = vmatpush.msra.mxu0 %v1771_v16 }
  0xf1   :  { %664 = vmatpush.msra.mxu0 %v1778_v18 }
  0xf3   :  { %665 = vmatpush.msra.mxu0 %v1785_v22 }
  0xf5   :  { %666 = vmatpush.msra.mxu0 %v1792_v28 }
 0x126   :  { %v298_v52 = vpop.f32.mrf.mxu1 }
 0x127   :  { %v310_v60 = vmul.f32 %v298_v52, %v1718_v57 }
 0x12c   :  { %v340_v54 = vpop.f32.mrf.mxu2 }
 0x12e   :  { %v301_v53 = vpop.f32.mrf.mxu1 }
 0x12f   :  { %v311_v59 = vmul.f32 %v301_v53, %v1716_v55  ;;  %v1804_v53 = vld [vmem:[#allocation10 + $0x18] sm:$0xff] }
 0x131   :  { %v314_v0 = vadd.f32 %v311_v59, %v310_v60 }
 0x134   :  { %v343_v62 = vpop.f32.mrf.mxu2 }
 0x136   :  { %v304_v56 = vpop.f32.mrf.mxu1 }
 0x137   :  { %v312_v61 = vmul.f32 %v304_v56, %v1720_v58  ;;  %v1806_v56 = vld [vmem:[#allocation10 + $0x8] sm:$0xff] }
 0x139   :  { %v315_v2 = vadd.f32 %v314_v0, %v312_v61  ;;  %v1820_v0 = vld [vmem:[%s1966_s6 + $0x20] sm:$0xff] }
 0x13c   :  { %v346_v12 = vpop.f32.mrf.mxu2 }
 0x13e   :  { %v307_v1 = vpop.f32.mrf.mxu1 }
 0x13f   :  { %v313_v3 = vmul.f32 %v307_v1, %v1725_v63  ;;  %v1827_v1 = vld [vmem:[%s1966_s6 + $0x18] sm:$0xff] }
 0x141   :  { %v316_v6 = vadd.f32 %v315_v2, %v313_v3  ;;  %v1833_v2 = vld [vmem:[%s1966_s6 + $0x10] sm:$0xff]  ;;  %v1841_v3 = vld [vmem:[%s1966_s6 + $0x8] sm:$0xff] }
 0x143   :  { %v317_v8 = vrot.slane %v316_v6, 4 }
 0x144   :  { %v349_v30 = vpop.f32.mrf.mxu2 }
 0x145   :  { %v318_v10 = vadd.f32 %v317_v8, %v316_v6  ;;  %v1848_v6 = vld [vmem:[%s1966_s6] sm:$0xff] }
 0x147   :  { %v319_v13 = vrot.slane %v318_v10, 2 }
 0x149   :  { %v320_v15 = vadd.f32 %v319_v13, %v318_v10 }
 0x14b   :  { %v321_v17 = vrot.slane %v320_v15, 1 }
 0x14d   :  { %v322_v20 = vadd.f32 %v321_v17, %v320_v15 }
 0x14f   :  { %v347_v24 = vadd.f32 %v346_v12, %v322_v20  ;;  %v341_v26 = vadd.f32 %v340_v54, %v322_v20  ;;  %v350_v32 = vadd.f32 %v349_v30, %v322_v20  ;;  %v344_v42 = vadd.f32 %v343_v62, %v322_v20  ;;  %v1813_v62 = vld [vmem:[%s1966_s6 + $0x28] sm:$0xff] }
 0x150   :  { %398 = vmatpush.msra.mxu3 %v1813_v62  ;;  %667 = vmatpush.msra.mxu0 %v1813_v62 }
 0x151   :  { %vm354_vm1 = vcmp.gt.f32.partialorder %v347_v24, 0.0  ;;  %v358_v36 = vmul.f32 0.2, %v347_v24  ;;  %vm352_vm2 = vcmp.gt.f32.partialorder %v341_v26, 0.0  ;;  %v356_v40 = vmul.f32 0.2, %v341_v26 }
 0x152   :  { %v359_v50 = vmul.f32 0.2, %v350_v32  ;;  %vm355_vm3 = vcmp.gt.f32.partialorder %v350_v32, 0.0  ;;  %v357_v52 = vmul.f32 0.2, %v344_v42  ;;  %vm353_vm4 = vcmp.gt.f32.partialorder %v344_v42, 0.0  ;;  %399 = vmatpush.msra.mxu3 %v1820_v0  ;;  %668 = vmatpush.msra.mxu0 %v1820_v0 }
 0x153   :  { %v362_v44 = vsel %vm354_vm1, %v347_v24, %v358_v36  ;;  %v360_v48 = vsel %vm352_vm2, %v341_v26, %v356_v40 }
 0x154   :  { %v366_v46 = vadd.f32 %v362_v44, %v1796_v34  ;;  %v364_v51 = vadd.f32 %v360_v48, %v1798_v38  ;;  %v363_v54 = vsel %vm355_vm3, %v350_v32, %v359_v50  ;;  %v361_v59 = vsel %vm353_vm4, %v344_v42, %v357_v52  ;;  %400 = vmatpush.msra.mxu3 %v1827_v1  ;;  %v486_v52 = vld [vmem:[#allocation2 + $0x38] sm:$0xff] }
 0x155   :  { %v367_v60 = vadd.f32 %v363_v54, %v1804_v53  ;;  %v365_v61 = vadd.f32 %v361_v59, %v1806_v56  ;;  %669 = vmatpush.msra.mxu0 %v1827_v1  ;;  %511 = vmatpush.msrb.mxu1 %v486_v52  ;;  %v535_v52 = vld [vmem:[#allocation5 + $0x28] sm:$0xff] }
 0x156   :  { %372 = vmax.xlane.f32.xlu1 %v366_v46  ;;  %368 = vmax.xlane.f32.xlu0 %v364_v51 }
 0x157   :  { %401 = vmatpush.msra.mxu3 %v1833_v2  ;;  %670 = vmatpush.msra.mxu0 %v1833_v2 }
 0x159   :  { %402 = vmatpush.msra.mxu3 %v1841_v3  ;;  %671 = vmatpush.msra.mxu0 %v1841_v3 }
 0x15b   :  { %403 = vmatpush.msra.mxu3 %v1848_v6  ;;  %672 = vmatpush.msra.mxu0 %v1848_v6 }
 0x15e   :  { %374 = vmax.xlane.f32.xlu1 %v367_v60  ;;  %370 = vmax.xlane.f32.xlu0 %v365_v61 }
 0x1c9   :  { %v369_v8 = vpop.xlane.xlu0 %368  ;;  %v373_v13 = vpop.xlane.xlu1 %372 }
 0x1ca   :  { %v376_v10 = vsub.f32 %v364_v51, %v369_v8  ;;  %v378_v26 = vsub.f32 %v366_v46, %v373_v13 }
 0x1cc   :  { %v380_v12 = vmul.f32 1.442695, %v376_v10  ;;  %v384_v30 = vmul.f32 1.442695, %v378_v26 }
 0x1ce   :  { %1189 = vpow2.f32 %v380_v12 }
 0x1d1   :  { %v371_v15 = vpop.xlane.xlu0 %370  ;;  %v375_v32 = vpop.xlane.xlu1 %374 }
 0x1d2   :  { %v377_v17 = vsub.f32 %v365_v61, %v371_v15  ;;  %v379_v40 = vsub.f32 %v367_v60, %v375_v32  ;;  %v485_v32 = vld [vmem:[#allocation2 + $0x30] sm:$0xff] }
 0x1d3   :  { %512 = vmatpush.msrb.mxu1 %v485_v32 }
 0x1d4   :  { %v1190_v20 = vpop.eup %1189  ;;  %v382_v24 = vmul.f32 1.442695, %v377_v17  ;;  %v386_v42 = vmul.f32 1.442695, %v379_v40  ;;  %v483_v40 = vld [vmem:[#allocation2 + $0x20] sm:$0xff] }
 0x1d5   :  { %404 = vmatmul.f32.vlgmr.msra.gmra.mxu3 %v1190_v20 }
 0x1d6   :  { %1191 = vpow2.f32 %v382_v24 }
 0x1d7   :  { %1193 = vpow2.f32 %v384_v30 }
 0x1d8   :  { %1195 = vpow2.f32 %v386_v42  ;;  %v537_v42 = vld [vmem:[#allocation5 + $0x38] sm:$0xff] }
 0x1d9   :  { %562 = vmatpush.msrb.mxu2 %v537_v42 }
 0x1dc   :  { %v1192_v36 = vpop.eup %1191 }
 0x1dd   :  { %407 = vmatmul.f32.gmra.mxu3 %v1192_v36  ;;  %v1194_v44 = vpop.eup %1193 }
 0x1de   :  { %v1196_v48 = vpop.eup %1195 }
 0x1e5   :  { %410 = vmatmul.f32.gmra.mxu3 %v1194_v44 }
 0x1ed   :  { %413 = vmatmul.f32.gmra.mxu3 %v1196_v48 }
 0x258   :  { %v405_v50 = vpop.f32.mrf.mxu3 }
 0x259   :  { %v417_v51 = vmax.f32 %v405_v50, 1e-30  ;;  %v532_v50 = vld [vmem:[#allocation7 + $0x38] sm:$0xff] }
 0x25a   :  { %604 = vmatpush.msrb.mxu3 %v532_v50 }
 0x25b   :  { %1197 = vrcp.f32 %v417_v51  ;;  %v536_v51 = vld [vmem:[#allocation5 + $0x30] sm:$0xff] }
 0x25c   :  { %563 = vmatpush.msrb.mxu2 %v536_v51 }
 0x25e   :  { %564 = vmatpush.msrb.mxu2 %v535_v52 }
 0x260   :  { %v408_v54 = vpop.f32.mrf.mxu3 }
 0x261   :  { %v1198_v46 = vpop.eup %1197  ;;  %v418_v59 = vmax.f32 %v408_v54, 1e-30  ;;  %v530_v54 = vld [vmem:[#allocation7 + $0x28] sm:$0xff] }
 0x262   :  { %v425_v61 = vmul.f32 %v1198_v46, %v1190_v20  ;;  %v484_v20 = vld [vmem:[#allocation2 + $0x28] sm:$0xff] }
 0x263   :  { %1199 = vrcp.f32 %v418_v59  ;;  %513 = vmatpush.msrb.mxu1 %v484_v20 }
 0x264   :  { %465 = vmatmul.f32.vlgmr.msrb.gmra.mxu0 %v425_v61 }
 0x265   :  { %514 = vmatpush.msrb.mxu1 %v483_v40 }
 0x268   :  { %v411_v8 = vpop.f32.mrf.mxu3 }
 0x269   :  { %v1200_v10 = vpop.eup %1199  ;;  %v419_v60 = vmax.f32 %v411_v8, 1e-30 }
 0x26a   :  { %v426_v12 = vmul.f32 %v1200_v10, %v1192_v36  ;;  %v1184_v36 = vld [vmem:[%s1964_s4] ss:$0 sm:$0xff] }
 0x26b   :  { %1201 = vrcp.f32 %v419_v60 }
 0x26c   :  { %468 = vmatmul.f32.gmra.mxu0 %v426_v12 }
 0x270   :  { %v414_v13 = vpop.f32.mrf.mxu3 }
 0x271   :  { %v1202_v15 = vpop.eup %1201  ;;  %v420_v17 = vmax.f32 %v414_v13, 1e-30 }
 0x272   :  { %v427_v24 = vmul.f32 %v1202_v15, %v1194_v44  ;;  %v531_v44 = vld [vmem:[#allocation7 + $0x30] sm:$0xff] }
 0x273   :  { %1203 = vrcp.f32 %v420_v17  ;;  %605 = vmatpush.msrb.mxu3 %v531_v44 }
 0x274   :  { %471 = vmatmul.f32.gmra.mxu0 %v427_v24 }
 0x275   :  { %606 = vmatpush.msrb.mxu3 %v530_v54 }
 0x279   :  { %v1204_v26 = vpop.eup %1203 }
 0x27a   :  { %v428_v30 = vmul.f32 %v1204_v26, %v1196_v48  ;;  %v534_v26 = vld [vmem:[#allocation5 + $0x20] sm:$0xff] }
 0x27b   :  { %565 = vmatpush.msrb.mxu2 %v534_v26 }
 0x27c   :  { %474 = vmatmul.f32.gmra.mxu0 %v428_v30  ;;  %v529_v30 = vld [vmem:[#allocation7 + $0x20] sm:$0xff] }
 0x27d   :  { %607 = vmatpush.msrb.mxu3 %v529_v30 }
 0x2e1   :  { %v466_v48 = vpop.f32.mrf.mxu0 }
 0x2e2   :  { %v467_v46 = vadd.f32 %v1184_v36, %v466_v48 }
 0x2e4   :  { %v478_v59 = vmax.f32 %v467_v46, 0.0 }
 0x2e6   :  { %1144 = vmatmul.msk.f32.vlgmr.msrb.gmra.mxu1 %vm219_vm0, %v478_v59 }
 0x2e9   :  { %v469_v61 = vpop.f32.mrf.mxu0 }
 0x2ea   :  { %v470_v8 = vadd.f32 %v1184_v36, %v469_v61 }
 0x2ec   :  { %v479_v10 = vmax.f32 %v470_v8, 0.0 }
 0x2ee   :  { %1145 = vmatmul.msk.f32.gmra.mxu1 %vm219_vm0, %v479_v10 }
 0x2f1   :  { %v472_v60 = vpop.f32.mrf.mxu0 }
 0x2f2   :  { %v473_v12 = vadd.f32 %v1184_v36, %v472_v60 }
 0x2f4   :  { %v480_v13 = vmax.f32 %v473_v12, 0.0 }
 0x2f6   :  { %1146 = vmatmul.msk.f32.gmra.mxu1 %vm219_vm0, %v480_v13 }
 0x2f9   :  { %v475_v15 = vpop.f32.mrf.mxu0 }
 0x2fa   :  { %v476_v17 = vadd.f32 %v1184_v36, %v475_v15 }
 0x2fc   :  { %v481_v24 = vmax.f32 %v476_v17, 0.0 }
 0x2fe   :  { %1147 = vmatmul.msk.f32.gmra.mxu1 %vm219_vm0, %v481_v24 }
 0x363   :  { %v516_v32 = vpop.f32.mrf.mxu1 }
 0x364   :  { %1148 = vmatmul.msk.f32.vlgmr.msrb.gmra.mxu2 %vm219_vm0, %v516_v32  ;;  %1152 = vmatmul.msk.f32.vlgmr.msrb.gmra.mxu3 %vm219_vm0, %v516_v32  ;;  %v710_v44 = vmul.f32 %v516_v32, %v1640_v25  ;;  %v706_v46 = vmul.f32 %v516_v32, %v1664_v33  ;;  %v702_v10 = vmul.f32 %v516_v32, %v1688_v41 }
 0x365   :  { %v698_v15 = vmul.f32 %v516_v32, %v1712_v49 }
 0x36b   :  { %v519_v20 = vpop.f32.mrf.mxu1 }
 0x36c   :  { %1149 = vmatmul.msk.f32.gmra.mxu2 %vm219_vm0, %v519_v20  ;;  %1153 = vmatmul.msk.f32.gmra.mxu3 %vm219_vm0, %v519_v20  ;;  %v711_v51 = vmul.f32 %v519_v20, %v1634_v23  ;;  %v707_v48 = vmul.f32 %v519_v20, %v1658_v31  ;;  %v703_v8 = vmul.f32 %v519_v20, %v1682_v39 }
 0x36d   :  { %v699_v13 = vmul.f32 %v519_v20, %v1706_v47 }
 0x373   :  { %v522_v40 = vpop.f32.mrf.mxu1 }
 0x374   :  { %1150 = vmatmul.msk.f32.gmra.mxu2 %vm219_vm0, %v522_v40  ;;  %1154 = vmatmul.msk.f32.gmra.mxu3 %vm219_vm0, %v522_v40  ;;  %v712_v50 = vmul.f32 %v522_v40, %v1626_v21  ;;  %v708_v54 = vmul.f32 %v522_v40, %v1652_v29  ;;  %v704_v61 = vmul.f32 %v522_v40, %v1676_v37 }
 0x375   :  { %v700_v12 = vmul.f32 %v522_v40, %v1700_v45 }
 0x37b   :  { %v525_v36 = vpop.f32.mrf.mxu1 }
 0x37c   :  { %1151 = vmatmul.msk.f32.gmra.mxu2 %vm219_vm0, %v525_v36  ;;  %1155 = vmatmul.msk.f32.gmra.mxu3 %vm219_vm0, %v525_v36  ;;  %v713_v42 = vmul.f32 %v525_v36, %v1621_v19  ;;  %v709_v52 = vmul.f32 %v525_v36, %v1646_v27  ;;  %v705_v59 = vmul.f32 %v525_v36, %v1670_v35 }
 0x37d   :  { %v701_v60 = vmul.f32 %v525_v36, %v1694_v43 }
 0x37e   :  { %719 = vmatpush.msra.mxu1 %v713_v42 }
 0x380   :  { %720 = vmatpush.msra.mxu1 %v712_v50 }
 0x382   :  { %721 = vmatpush.msra.mxu1 %v711_v51 }
 0x384   :  { %722 = vmatpush.msra.mxu1 %v710_v44 }
 0x386   :  { %723 = vmatpush.msra.mxu1 %v709_v52 }
 0x388   :  { %724 = vmatpush.msra.mxu1 %v708_v54 }
 0x38a   :  { %725 = vmatpush.msra.mxu1 %v707_v48 }
 0x38c   :  { %726 = vmatpush.msra.mxu1 %v706_v46 }
 0x38e   :  { %727 = vmatpush.msra.mxu1 %v705_v59 }
 0x390   :  { %728 = vmatpush.msra.mxu1 %v704_v61 }
 0x392   :  { %729 = vmatpush.msra.mxu1 %v703_v8 }
 0x394   :  { %730 = vmatpush.msra.mxu1 %v702_v10 }
 0x396   :  { %731 = vmatpush.msra.mxu1 %v701_v60 }
 0x398   :  { %732 = vmatpush.msra.mxu1 %v700_v12 }
 0x39a   :  { %733 = vmatpush.msra.mxu1 %v699_v13 }
 0x39c   :  { %734 = vmatpush.msra.mxu1 %v698_v15 }
 0x39e   :  { %927 = vmatpush.msrb.mxu1 %v1731_v4 }
 0x3a0   :  { %928 = vmatpush.msrb.mxu1 %v1736_v5 }
 0x3a2   :  { %929 = vmatpush.msrb.mxu1 %v1743_v7 }
 0x3a4   :  { %930 = vmatpush.msrb.mxu1 %v1750_v9 }
 0x3a6   :  { %931 = vmatpush.msrb.mxu1 %v1757_v11 }
 0x3a8   :  { %932 = vmatpush.msrb.mxu1 %v1764_v14 }
 0x3aa   :  { %933 = vmatpush.msrb.mxu1 %v1771_v16 }
 0x3ac   :  { %934 = vmatpush.msrb.mxu1 %v1778_v18 }
 0x3ae   :  { %935 = vmatpush.msrb.mxu1 %v1785_v22 }
 0x3b0   :  { %936 = vmatpush.msrb.mxu1 %v1792_v28 }
 0x3b2   :  { %937 = vmatpush.msrb.mxu1 %v1813_v62 }
 0x3b4   :  { %938 = vmatpush.msrb.mxu1 %v1820_v0 }
 0x3b6   :  { %939 = vmatpush.msrb.mxu1 %v1827_v1 }
 0x3b8   :  { %940 = vmatpush.msrb.mxu1 %v1833_v2 }
 0x3ba   :  { %941 = vmatpush.msrb.mxu1 %v1841_v3 }
 0x3bc   :  { %942 = vmatpush.msrb.mxu1 %v1848_v6 }
 0x3e7   :  { %v567_v4 = vpop.f32.mrf.mxu2  ;;  %v609_v7 = vpop.f32.mrf.mxu3 }
 0x3e8   :  { %v579_v16 = vmul.f32 %v567_v4, %v1718_v57 }
 0x3ef   :  { %v570_v5 = vpop.f32.mrf.mxu2  ;;  %v612_v14 = vpop.f32.mrf.mxu3 }
 0x3f0   :  { %v580_v11 = vmul.f32 %v570_v5, %v1716_v55 }
 0x3f2   :  { %v583_v22 = vadd.f32 %v580_v11, %v579_v16 }
 0x3f7   :  { %v573_v9 = vpop.f32.mrf.mxu2  ;;  %v615_v3 = vpop.f32.mrf.mxu3 }
 0x3f8   :  { %v581_v18 = vmul.f32 %v573_v9, %v1720_v58 }
 0x3fa   :  { %v584_v62 = vadd.f32 %v583_v22, %v581_v18 }
 0x3ff   :  { %v576_v28 = vpop.f32.mrf.mxu2  ;;  %v618_v32 = vpop.f32.mrf.mxu3 }
 0x400   :  { %v582_v0 = vmul.f32 %v576_v28, %v1725_v63 }
 0x402   :  { %v585_v1 = vadd.f32 %v584_v62, %v582_v0 }
 0x404   :  { %v586_v2 = vrot.slane %v585_v1, 4 }
 0x406   :  { %v587_v6 = vadd.f32 %v586_v2, %v585_v1 }
 0x408   :  { %v588_v17 = vrot.slane %v587_v6, 2 }
 0x40a   :  { %v589_v24 = vadd.f32 %v588_v17, %v587_v6  ;;  %v756_v6 = vld [vmem:[#allocation2 + $0x58] sm:$0xff] }
 0x40b   :  { %781 = vmatpush.msra.mxu2 %v756_v6 }
 0x40c   :  { %v590_v26 = vrot.slane %v589_v24, 1 }
 0x40e   :  { %v591_v30 = vadd.f32 %v590_v26, %v589_v24 }
 0x410   :  { %v619_v20 = vadd.f32 %v618_v32, %v591_v30  ;;  %v616_v40 = vadd.f32 %v615_v3, %v591_v30  ;;  %v610_v36 = vadd.f32 %v609_v7, %v591_v30  ;;  %v613_v44 = vadd.f32 %v612_v14, %v591_v30 }
 0x412   :  { %v628_v42 = vmul.f32 0.2, %v619_v20  ;;  %vm624_vm5 = vcmp.gt.f32.partialorder %v619_v20, 0.0  ;;  %vm623_vm6 = vcmp.gt.f32.partialorder %v616_v40, 0.0  ;;  %v627_v50 = vmul.f32 0.2, %v616_v40 }
 0x413   :  { %vm621_vm7 = vcmp.gt.f32.partialorder %v610_v36, 0.0  ;;  %v625_v51 = vmul.f32 0.2, %v610_v36  ;;  %v626_v8 = vmul.f32 0.2, %v613_v44  ;;  %vm622_vm8 = vcmp.gt.f32.partialorder %v613_v44, 0.0 }
 0x414   :  { %v632_v52 = vsel %vm624_vm5, %v619_v20, %v628_v42  ;;  %v631_v54 = vsel %vm623_vm6, %v616_v40, %v627_v50 }
 0x415   :  { %v636_v48 = vadd.f32 %v632_v52, %v1804_v53  ;;  %v635_v46 = vadd.f32 %v631_v54, %v1796_v34  ;;  %v629_v59 = vsel %vm621_vm7, %v610_v36, %v625_v51  ;;  %v630_v10 = vsel %vm622_vm8, %v613_v44, %v626_v8  ;;  %v807_v8 = vld [vmem:[#allocation5 + $0x58] sm:$0xff] }
 0x416   :  { %v633_v61 = vadd.f32 %v629_v59, %v1798_v38  ;;  %v634_v60 = vadd.f32 %v630_v10, %v1806_v56  ;;  %v753_v59 = vld [vmem:[#allocation2 + $0x40] sm:$0xff]  ;;  %v802_v10 = vld [vmem:[#allocation7 + $0x58] sm:$0xff]  ;;  %832 = vmatpush.msra.mxu3 %v807_v8 }
 0x417   :  { %643 = vmax.xlane.f32.xlu1 %v636_v48  ;;  %641 = vmax.xlane.f32.xlu0 %v635_v46 }
 0x418   :  { %637 = vmax.xlane.f32.xlu2 %v633_v61  ;;  %874 = vmatpush.msrb.mxu0 %v802_v10 }
 0x420   :  { %639 = vmax.xlane.f32.xlu2 %v634_v60 }
 0x48a   :  { %v642_v7 = vpop.xlane.xlu0 %641  ;;  %v644_v22 = vpop.xlane.xlu1 %643 }
 0x48b   :  { %v638_v12 = vpop.xlane.xlu2 %637  ;;  %v647_v14 = vsub.f32 %v635_v46, %v642_v7  ;;  %v648_v28 = vsub.f32 %v636_v48, %v644_v22  ;;  %v755_v48 = vld [vmem:[#allocation2 + $0x50] sm:$0xff]  ;;  %v754_v46 = vld [vmem:[#allocation2 + $0x48] sm:$0xff] }
 0x48c   :  { %v645_v13 = vsub.f32 %v633_v61, %v638_v12  ;;  %782 = vmatpush.msra.mxu2 %v755_v48  ;;  %v1185_v61 = vld [vmem:[%s1964_s4 + $0x1] ss:$0 sm:$0xff]  ;;  %v801_v12 = vld [vmem:[#allocation7 + $0x50] sm:$0xff] }
 0x48d   :  { %v653_v16 = vmul.f32 1.442695, %v647_v14  ;;  %v655_v62 = vmul.f32 1.442695, %v648_v28  ;;  %875 = vmatpush.msrb.mxu0 %v801_v12 }
 0x48e   :  { %v649_v15 = vmul.f32 1.442695, %v645_v13  ;;  %783 = vmatpush.msra.mxu2 %v754_v46  ;;  %v805_v13 = vld [vmem:[#allocation5 + $0x48] sm:$0xff] }
 0x490   :  { %1205 = vpow2.f32 %v649_v15  ;;  %784 = vmatpush.msra.mxu2 %v753_v59  ;;  %v800_v15 = vld [vmem:[#allocation7 + $0x48] sm:$0xff] }
 0x491   :  { %876 = vmatpush.msrb.mxu0 %v800_v15 }
 0x493   :  { %v640_v4 = vpop.xlane.xlu2 %639 }
 0x494   :  { %v646_v5 = vsub.f32 %v634_v60, %v640_v4  ;;  %v806_v60 = vld [vmem:[#allocation5 + $0x50] sm:$0xff] }
 0x495   :  { %833 = vmatpush.msra.mxu3 %v806_v60 }
 0x496   :  { %v651_v9 = vmul.f32 1.442695, %v646_v5  ;;  %v1206_v11 = vpop.eup %1205 }
 0x497   :  { %673 = vmatmul.f32.vlgmr.msra.gmra.mxu0 %v1206_v11  ;;  %834 = vmatpush.msra.mxu3 %v805_v13 }
 0x498   :  { %1207 = vpow2.f32 %v651_v9 }
 0x499   :  { %1209 = vpow2.f32 %v653_v16 }
 0x49a   :  { %1211 = vpow2.f32 %v655_v62 }
 0x49e   :  { %v1208_v18 = vpop.eup %1207 }
 0x49f   :  { %676 = vmatmul.f32.gmra.mxu0 %v1208_v18  ;;  %v1210_v0 = vpop.eup %1209 }
 0x4a0   :  { %v1212_v1 = vpop.eup %1211 }
 0x4a7   :  { %679 = vmatmul.f32.gmra.mxu0 %v1210_v0 }
 0x4af   :  { %682 = vmatmul.f32.gmra.mxu0 %v1212_v1 }
 0x514   :  { %v674_v2 = vpop.f32.mrf.mxu0 }
 0x515   :  { %v686_v3 = vmax.f32 %v674_v2, 1e-30  ;;  %v799_v2 = vld [vmem:[#allocation7 + $0x40] sm:$0xff] }
 0x516   :  { %877 = vmatpush.msrb.mxu0 %v799_v2 }
 0x517   :  { %1213 = vrcp.f32 %v686_v3 }
 0x51c   :  { %v677_v17 = vpop.f32.mrf.mxu0 }
 0x51d   :  { %v1214_v24 = vpop.eup %1213  ;;  %v687_v26 = vmax.f32 %v677_v17, 1e-30 }
 0x51e   :  { %v694_v30 = vmul.f32 %v1214_v24, %v1206_v11 }
 0x51f   :  { %1215 = vrcp.f32 %v687_v26 }
 0x520   :  { %735 = vmatmul.f32.vlgmr.msra.gmra.mxu1 %v694_v30 }
 0x524   :  { %v680_v32 = vpop.f32.mrf.mxu0 }
 0x525   :  { %v1216_v20 = vpop.eup %1215  ;;  %v688_v40 = vmax.f32 %v680_v32, 1e-30 }
 0x526   :  { %v695_v36 = vmul.f32 %v1216_v20, %v1208_v18 }
 0x527   :  { %1217 = vrcp.f32 %v688_v40 }
 0x528   :  { %738 = vmatmul.f32.gmra.mxu1 %v695_v36 }
 0x52c   :  { %v683_v42 = vpop.f32.mrf.mxu0 }
 0x52d   :  { %v1218_v50 = vpop.eup %1217  ;;  %v689_v51 = vmax.f32 %v683_v42, 1e-30 }
 0x52e   :  { %v696_v44 = vmul.f32 %v1218_v50, %v1210_v0 }
 0x52f   :  { %1219 = vrcp.f32 %v689_v51 }
 0x530   :  { %741 = vmatmul.f32.gmra.mxu1 %v696_v44 }
 0x535   :  { %v1220_v52 = vpop.eup %1219 }
 0x536   :  { %v697_v54 = vmul.f32 %v1220_v52, %v1212_v1  ;;  %v804_v1 = vld [vmem:[#allocation5 + $0x40] sm:$0xff] }
 0x537   :  { %835 = vmatpush.msra.mxu3 %v804_v1 }
 0x538   :  { %744 = vmatmul.f32.gmra.mxu1 %v697_v54 }
 0x59d   :  { %v736_v4 = vpop.f32.mrf.mxu1 }
 0x59e   :  { %v737_v5 = vadd.f32 %v1185_v61, %v736_v4 }
 0x5a0   :  { %v748_v7 = vmax.f32 %v737_v5, 0.0 }
 0x5a2   :  { %1157 = vmatmul.msk.f32.vlgmr.msra.gmra.mxu2 %vm219_vm0, %v748_v7 }
 0x5a5   :  { %v739_v9 = vpop.f32.mrf.mxu1 }
 0x5a6   :  { %v740_v11 = vadd.f32 %v1185_v61, %v739_v9 }
 0x5a8   :  { %v749_v14 = vmax.f32 %v740_v11, 0.0 }
 0x5aa   :  { %1158 = vmatmul.msk.f32.gmra.mxu2 %vm219_vm0, %v749_v14 }
 0x5ad   :  { %v742_v16 = vpop.f32.mrf.mxu1 }
 0x5ae   :  { %v743_v18 = vadd.f32 %v1185_v61, %v742_v16 }
 0x5b0   :  { %v750_v22 = vmax.f32 %v743_v18, 0.0 }
 0x5b2   :  { %1159 = vmatmul.msk.f32.gmra.mxu2 %vm219_vm0, %v750_v22 }
 0x5b5   :  { %v745_v28 = vpop.f32.mrf.mxu1 }
 0x5b6   :  { %v746_v62 = vadd.f32 %v1185_v61, %v745_v28 }
 0x5b8   :  { %v751_v0 = vmax.f32 %v746_v62, 0.0 }
 0x5ba   :  { %1160 = vmatmul.msk.f32.gmra.mxu2 %vm219_vm0, %v751_v0 }
 0x625   :  { %v786_v3 = vpop.f32.mrf.mxu2 }
 0x626   :  { %1161 = vmatmul.msk.f32.vlgmr.msra.gmra.mxu3 %vm219_vm0, %v786_v3  ;;  %1165 = vmatmul.msk.f32.vlgmr.msrb.gmra.mxu0 %vm219_vm0, %v786_v3  ;;  %v980_v20 = vmul.f32 %v786_v3, %v1640_v25 }
 0x62d   :  { %v789_v6 = vpop.f32.mrf.mxu2 }
 0x62e   :  { %1162 = vmatmul.msk.f32.gmra.mxu3 %vm219_vm0, %v789_v6  ;;  %1166 = vmatmul.msk.f32.gmra.mxu0 %vm219_vm0, %v789_v6  ;;  %v981_v32 = vmul.f32 %v789_v6, %v1634_v23  ;;  %v977_v42 = vmul.f32 %v789_v6, %v1658_v31  ;;  %v973_v25 = vmul.f32 %v789_v6, %v1682_v39 }
 0x635   :  { %v792_v17 = vpop.f32.mrf.mxu2 }
 0x636   :  { %1163 = vmatmul.msk.f32.gmra.mxu3 %vm219_vm0, %v792_v17  ;;  %1167 = vmatmul.msk.f32.gmra.mxu0 %vm219_vm0, %v792_v17  ;;  %v982_v30 = vmul.f32 %v792_v17, %v1626_v21  ;;  %v978_v36 = vmul.f32 %v792_v17, %v1652_v29  ;;  %v974_v23 = vmul.f32 %v792_v17, %v1676_v37 }
 0x637   :  { %v970_v31 = vmul.f32 %v792_v17, %v1700_v45 }
 0x63d   :  { %v795_v24 = vpop.f32.mrf.mxu2 }
 0x63e   :  { %1164 = vmatmul.msk.f32.gmra.mxu3 %vm219_vm0, %v795_v24  ;;  %1168 = vmatmul.msk.f32.gmra.mxu0 %vm219_vm0, %v795_v24  ;;  %v983_v26 = vmul.f32 %v795_v24, %v1621_v19  ;;  %v979_v40 = vmul.f32 %v795_v24, %v1646_v27  ;;  %v976_v19 = vmul.f32 %v786_v3, %v1664_v33 }
 0x63f   :  { %v975_v21 = vmul.f32 %v795_v24, %v1670_v35  ;;  %v972_v27 = vmul.f32 %v786_v3, %v1688_v41  ;;  %v971_v29 = vmul.f32 %v795_v24, %v1694_v43  ;;  %v969_v33 = vmul.f32 %v789_v6, %v1706_v47 }
 0x640   :  { %989 = vmatpush.msrb.mxu2 %v983_v26  ;;  %v968_v35 = vmul.f32 %v786_v3, %v1712_v49 }
 0x642   :  { %990 = vmatpush.msrb.mxu2 %v982_v30 }
 0x644   :  { %991 = vmatpush.msrb.mxu2 %v981_v32 }
 0x646   :  { %992 = vmatpush.msrb.mxu2 %v980_v20 }
 0x648   :  { %993 = vmatpush.msrb.mxu2 %v979_v40 }
 0x64a   :  { %994 = vmatpush.msrb.mxu2 %v978_v36 }
 0x64c   :  { %995 = vmatpush.msrb.mxu2 %v977_v42 }
 0x64e   :  { %996 = vmatpush.msrb.mxu2 %v976_v19 }
 0x650   :  { %997 = vmatpush.msrb.mxu2 %v975_v21 }
 0x652   :  { %998 = vmatpush.msrb.mxu2 %v974_v23 }
 0x654   :  { %999 = vmatpush.msrb.mxu2 %v973_v25 }
 0x656   :  { %1000 = vmatpush.msrb.mxu2 %v972_v27 }
 0x658   :  { %1001 = vmatpush.msrb.mxu2 %v971_v29 }
 0x65a   :  { %1002 = vmatpush.msrb.mxu2 %v970_v31 }
 0x65c   :  { %1003 = vmatpush.msrb.mxu2 %v969_v33 }
 0x65e   :  { %1004 = vmatpush.msrb.mxu2 %v968_v35 }
 0x6a3   :  { %v879_v51 = vpop.f32.mrf.mxu0 }
 0x6a9   :  { %v837_v37 = vpop.f32.mrf.mxu3 }
 0x6aa   :  { %v849_v41 = vmul.f32 %v837_v37, %v1718_v57 }
 0x6ab   :  { %v882_v52 = vpop.f32.mrf.mxu0 }
 0x6b1   :  { %v840_v50 = vpop.f32.mrf.mxu3 }
 0x6b2   :  { %v850_v44 = vmul.f32 %v840_v50, %v1716_v55 }
 0x6b3   :  { %v885_v61 = vpop.f32.mrf.mxu0 }
 0x6b4   :  { %v853_v54 = vadd.f32 %v850_v44, %v849_v41 }
 0x6b9   :  { %v843_v39 = vpop.f32.mrf.mxu3 }
 0x6ba   :  { %v851_v43 = vmul.f32 %v843_v39, %v1720_v58 }
 0x6bb   :  { %v888_v57 = vpop.f32.mrf.mxu0 }
 0x6bc   :  { %v854_v48 = vadd.f32 %v853_v54, %v851_v43  ;;  %v1045_v43 = vld [vmem:[#allocation13 + $0x18] sm:$0xff]  ;;  %v1043_v54 = vld [vmem:[#allocation13 + $0x8] sm:$0xff] }
 0x6bd   :  { %1065 = vmatpush.msra.mxu0 %v1045_v43 }
 0x6c1   :  { %v846_v45 = vpop.f32.mrf.mxu3 }
 0x6c2   :  { %v852_v47 = vmul.f32 %v846_v45, %v1725_v63  ;;  %v1042_v45 = vld [vmem:[#allocation13] sm:$0xff] }
 0x6c4   :  { %v855_v46 = vadd.f32 %v854_v48, %v852_v47 }
 0x6c6   :  { %v856_v59 = vrot.slane %v855_v46, 4 }
 0x6c8   :  { %v857_v49 = vadd.f32 %v856_v59, %v855_v46  ;;  %v1186_v46 = vld [vmem:[%s1964_s4 + $0x2] ss:$0 sm:$0xff] }
 0x6ca   :  { %v858_v8 = vrot.slane %v857_v49, 2 }
 0x6cc   :  { %v859_v10 = vadd.f32 %v858_v8, %v857_v49 }
 0x6ce   :  { %v860_v60 = vrot.slane %v859_v10, 1 }
 0x6d0   :  { %v861_v12 = vadd.f32 %v860_v60, %v859_v10  ;;  %v1018_v60 = vld [vmem:[#allocation11] sm:$0xff] }
 0x6d2   :  { %v886_v13 = vadd.f32 %v885_v61, %v861_v12  ;;  %v883_v55 = vadd.f32 %v882_v52, %v861_v12  ;;  %v880_v15 = vadd.f32 %v879_v51, %v861_v12  ;;  %v889_v7 = vadd.f32 %v888_v57, %v861_v12  ;;  %v1044_v52 = vld [vmem:[#allocation13 + $0x10] sm:$0xff]  ;;  %v1081_v12 = vld [vmem:[#allocation14 + $0x38] sm:$0xff] }
 0x6d3   :  { %1066 = vmatpush.msra.mxu0 %v1044_v52  ;;  %1098 = vmatpush.msra.mxu1 %v1081_v12  ;;  %v1077_v57 = vld [vmem:[#allocation14 + $0x18] sm:$0xff] }
 0x6d4   :  { %vm893_vm9 = vcmp.gt.f32.partialorder %v886_v13, 0.0  ;;  %v897_v58 = vmul.f32 0.2, %v886_v13  ;;  %vm892_vm10 = vcmp.gt.f32.partialorder %v883_v55, 0.0  ;;  %v896_v4 = vmul.f32 0.2, %v883_v55 }
 0x6d5   :  { %vm891_vm11 = vcmp.gt.f32.partialorder %v880_v15, 0.0  ;;  %v895_v5 = vmul.f32 0.2, %v880_v15  ;;  %v898_v22 = vmul.f32 0.2, %v889_v7  ;;  %vm894_vm12 = vcmp.gt.f32.partialorder %v889_v7, 0.0  ;;  %1067 = vmatpush.msra.mxu0 %v1043_v54 }
 0x6d6   :  { %v901_v63 = vsel %vm893_vm9, %v886_v13, %v897_v58  ;;  %v900_v9 = vsel %vm892_vm10, %v883_v55, %v896_v4  ;;  %v1080_v13 = vld [vmem:[#allocation14 + $0x30] sm:$0xff]  ;;  %v1079_v55 = vld [vmem:[#allocation14 + $0x28] sm:$0xff] }
 0x6d7   :  { %v905_v11 = vadd.f32 %v901_v63, %v1796_v34  ;;  %v904_v14 = vadd.f32 %v900_v9, %v1806_v56  ;;  %v899_v16 = vsel %vm891_vm11, %v880_v15, %v895_v5  ;;  %v902_v28 = vsel %vm894_vm12, %v889_v7, %v898_v22  ;;  %1068 = vmatpush.msra.mxu0 %v1042_v45  ;;  %v1078_v15 = vld [vmem:[#allocation14 + $0x20] sm:$0xff]  ;;  %v1076_v58 = vld [vmem:[#allocation14 + $0x10] sm:$0xff]  ;;  %v1075_v4 = vld [vmem:[#allocation14 + $0x8] sm:$0xff] }
 0x6d8   :  { %v903_v18 = vadd.f32 %v899_v16, %v1798_v38  ;;  %v906_v62 = vadd.f32 %v902_v28, %v1804_v53  ;;  %1099 = vmatpush.msra.mxu1 %v1080_v13  ;;  %v1074_v7 = vld [vmem:[#allocation14] sm:$0xff]  ;;  %v1187_v63 = vld [vmem:[%s1971_s11] ss:$0 sm:$0xff] }
 0x6d9   :  { %911 = vmax.xlane.f32.xlu1 %v905_v11  ;;  %909 = vmax.xlane.f32.xlu0 %v904_v14  ;;  %v1188_v16 = vld [vmem:[%s1973_s13] ss:$0 sm:$0xff] }
 0x6da   :  { %907 = vmax.xlane.f32.xlu2 %v903_v18  ;;  %1100 = vmatpush.msra.mxu1 %v1079_v55 }
 0x6dc   :  { %1101 = vmatpush.msra.mxu1 %v1078_v15 }
 0x6de   :  { %1102 = vmatpush.msra.mxu1 %v1077_v57 }
 0x6e0   :  { %1103 = vmatpush.msra.mxu1 %v1076_v58 }
 0x6e2   :  { %913 = vmax.xlane.f32.xlu2 %v906_v62  ;;  %1104 = vmatpush.msra.mxu1 %v1075_v4 }
 0x6e4   :  { %1105 = vmatpush.msra.mxu1 %v1074_v7 }
 0x74c   :  { %v910_v2 = vpop.xlane.xlu0 %909  ;;  %v912_v56 = vpop.xlane.xlu1 %911 }
 0x74d   :  { %v908_v0 = vpop.xlane.xlu2 %907  ;;  %v916_v6 = vsub.f32 %v904_v14, %v910_v2  ;;  %v917_v38 = vsub.f32 %v905_v11, %v912_v56 }
 0x74e   :  { %v915_v1 = vsub.f32 %v903_v18, %v908_v0 }
 0x74f   :  { %v921_v34 = vmul.f32 1.442695, %v916_v6  ;;  %v923_v24 = vmul.f32 1.442695, %v917_v38 }
 0x750   :  { %v919_v3 = vmul.f32 1.442695, %v915_v1 }
 0x752   :  { %1221 = vpow2.f32 %v919_v3 }
 0x753   :  { %1223 = vpow2.f32 %v921_v34 }
 0x754   :  { %1225 = vpow2.f32 %v923_v24 }
 0x755   :  { %v914_v26 = vpop.xlane.xlu2 %913 }
 0x756   :  { %v918_v32 = vsub.f32 %v906_v62, %v914_v26 }
 0x758   :  { %v1222_v17 = vpop.eup %1221  ;;  %v925_v53 = vmul.f32 1.442695, %v918_v32 }
 0x759   :  { %943 = vmatmul.f32.vlgmr.msrb.gmra.mxu1 %v1222_v17  ;;  %v1224_v30 = vpop.eup %1223 }
 0x75a   :  { %v1226_v20 = vpop.eup %1225  ;;  %1227 = vpow2.f32 %v925_v53 }
 0x760   :  { %v1228_v40 = vpop.eup %1227 }
 0x761   :  { %946 = vmatmul.f32.gmra.mxu1 %v1224_v30 }
 0x769   :  { %949 = vmatmul.f32.gmra.mxu1 %v1226_v20 }
 0x771   :  { %952 = vmatmul.f32.gmra.mxu1 %v1228_v40 }
 0x7d6   :  { %v944_v36 = vpop.f32.mrf.mxu1 }
 0x7d7   :  { %v956_v42 = vmax.f32 %v944_v36, 1e-30 }
 0x7d9   :  { %1229 = vrcp.f32 %v956_v42 }
 0x7de   :  { %v947_v19 = vpop.f32.mrf.mxu1 }
 0x7df   :  { %v1230_v21 = vpop.eup %1229  ;;  %v957_v23 = vmax.f32 %v947_v19, 1e-30 }
 0x7e0   :  { %v964_v25 = vmul.f32 %v1230_v21, %v1222_v17 }
 0x7e1   :  { %1231 = vrcp.f32 %v957_v23 }
 0x7e2   :  { %1005 = vmatmul.f32.vlgmr.msrb.gmra.mxu2 %v964_v25 }
 0x7e6   :  { %v950_v27 = vpop.f32.mrf.mxu1 }
 0x7e7   :  { %v1232_v29 = vpop.eup %1231  ;;  %v958_v31 = vmax.f32 %v950_v27, 1e-30 }
 0x7e8   :  { %v965_v33 = vmul.f32 %v1232_v29, %v1224_v30 }
 0x7e9   :  { %1233 = vrcp.f32 %v958_v31 }
 0x7ea   :  { %1008 = vmatmul.f32.gmra.mxu2 %v965_v33 }
 0x7ee   :  { %v953_v35 = vpop.f32.mrf.mxu1 }
 0x7ef   :  { %v1234_v37 = vpop.eup %1233  ;;  %v959_v50 = vmax.f32 %v953_v35, 1e-30 }
 0x7f0   :  { %v966_v51 = vmul.f32 %v1234_v37, %v1226_v20 }
 0x7f1   :  { %1235 = vrcp.f32 %v959_v50 }
 0x7f2   :  { %1011 = vmatmul.f32.gmra.mxu2 %v966_v51 }
 0x7f7   :  { %v1236_v39 = vpop.eup %1235 }
 0x7f8   :  { %v967_v44 = vmul.f32 %v1236_v39, %v1228_v40 }
 0x7fa   :  { %1014 = vmatmul.f32.gmra.mxu2 %v967_v44 }
 0x865   :  { %v1006_v41 = vpop.f32.mrf.mxu2 }
 0x866   :  { %v1007_v10 = vadd.f32 %v1186_v46, %v1006_v41 }
 0x86d   :  { %v1009_v48 = vpop.f32.mrf.mxu2 }
 0x86e   :  { %v1010_v8 = vadd.f32 %v1186_v46, %v1009_v48 }
 0x875   :  { %v1012_v47 = vpop.f32.mrf.mxu2 }
 0x876   :  { %v1013_v61 = vadd.f32 %v1186_v46, %v1012_v47 }
 0x87d   :  { %v1015_v59 = vpop.f32.mrf.mxu2 }
 0x87e   :  { %v1016_v49 = vadd.f32 %v1186_v46, %v1015_v59 }
 0x880   :  { %1034 = vmatpush.msrb.mxu3 %v1016_v49 }
 0x882   :  { %1035 = vmatpush.msrb.mxu3 %v1013_v61 }
 0x884   :  { %1036 = vmatpush.msrb.mxu3 %v1010_v8 }
 0x886   :  { %1037 = vmatpush.msrb.mxu3 %v1007_v10 }
 0x887   :  { %1170 = vmatmul.msk.f32.vlgmr.msrb.gmra.mxu3 %vm219_vm0, %v1018_v60 }
 0x90a   :  { %v1039_v5 = vpop.f32.mrf.mxu3 }
 0x90b   :  { %1171 = vmatmul.msk.f32.vlgmr.msra.gmra.mxu0 %vm219_vm0, %v1039_v5 }
 0x988   :  { %v1070_v9 = vpop.f32.mrf.mxu0 }
 0x989   :  { %v1071_v11 = vadd.f32 %v1187_v63, %v1070_v9 }
 0x98b   :  { %v1073_v14 = vmax.f32 %v1071_v11, 0.0 }
 0x98d   :  { %1172 = vmatmul.msk.f32.vlgmr.msra.gmra.mxu1 %vm1086_vm13, %v1073_v14 }
 0xa0a   :  { %v1107_v18 = vpop.f32.mrf.mxu1 }
 0xa0b   :  { %v1108_v22 = vadd.f32 %v1188_v16, %v1107_v18 }
 0xa0d   :  { %1110 = vst [vmem:[#allocation16] sm:$0xff] %v1108_v22 }
 0xa0e   :  { %1121 = dma.vmem_to_hbm [thread:$0]  %s1117_s17, 128, %s1119_s19, [#allocation4]  }
 0xa0f   :  { %1463 = dma.done.wait [#allocation4], 128  }
 0xa10   :  { %1464 = vsyncadd [#allocation4], 4294967168 }
 0xa11   :  { %1126 = vsyncpa [#allocation3], 1 }
 0xa12   :  { %1127 = vsyncpa [#allocation6], 1 }
 0xa13   :  { %1128 = vsyncpa [#allocation9], 1 }
 0xa14   :  { %1129 = vsyncpa [#allocation12], 1 }
 0xa15   :  { %1130 = vsyncpa [#allocation15], 1 }
 0xa16   :  { %1131 = vsyncpa [#allocation4], 1 }

</bundles_post_ra>
